<compile_context>
chip_gen: v7x
topology: tpu7x:2x2x1
jax: 0.10.0
libtpu: 0.0.40
codegen_flags: <defaults>
</compile_context>

<pallas_src>
import math

import jax
import jax.numpy as jnp
import numpy as np
from jax import lax
from jax.experimental import pallas as pl
from jax.experimental.pallas import tpu as pltpu


# ---------------------------------------------------------------------------
# Kernel
# ---------------------------------------------------------------------------
def _make_xattn_kernel(n_heads: int, head_dim: int, fuse_o: bool, exp_bf16: bool):
    def kernel(x_ref, k_ref, v_ref, wq_ref, wo_ref, o_ref):
        cdt = x_ref.dtype                      # MXU operand dtype (f32 or bf16)
        out_dim = o_ref.shape[2]
        tn = x_ref.shape[1]

        x = x_ref[0]                           # (TN, dim)
        k = k_ref[0]                           # (M,  hd)  (precomputed projection)
        v = v_ref[0]                           # (M,  hd)

        # Q projection (scale already folded into wq), f32 accumulation.
        q = jnp.dot(x, wq_ref[...], preferred_element_type=jnp.float32)  # (TN, hd)

        if fuse_o:
            pv_heads = []
        else:
            acc = jnp.zeros((tn, out_dim), dtype=jnp.float32)

        for h in range(n_heads):
            lo = h * head_dim
            qh = q[:, lo:lo + head_dim].astype(cdt)     # (TN, D)
            kh = k[:, lo:lo + head_dim]                  # (M,  D)
            vh = v[:, lo:lo + head_dim]                  # (M,  D)

            # scores: contract last dims of both operands (no explicit transpose).
            s = lax.dot_general(qh, kh, (((1,), (1,)), ((), ())),
                                preferred_element_type=jnp.float32)       # (TN, M)
            s_max = jnp.max(s, axis=-1, keepdims=True)
            z = s - s_max
            # bf16 exp only where the EUP supports it (v6e/v7x); f32 otherwise.
            p = jnp.exp(z.astype(jnp.bfloat16)) if exp_bf16 else jnp.exp(z)
            l = jnp.sum(p.astype(jnp.float32), axis=-1, keepdims=True)    # (TN, 1)

            pv = jnp.dot(p.astype(cdt), vh,
                         preferred_element_type=jnp.float32)              # (TN, D)
            # Normalize AFTER P@V (linear): TN*D muls instead of TN*M. Exact divide.
            pv = pv * (1.0 / l)

            if fuse_o:
                pv_heads.append(pv.astype(cdt))
            else:
                # Project through the matching block-row of wo and accumulate.
                acc = acc + jnp.dot(pv.astype(cdt), wo_ref[lo:lo + head_dim, :],
                                    preferred_element_type=jnp.float32)

        if fuse_o:
            # Single wide matmul: full K=hd contraction keeps the MXU deep.
            o_all = jnp.concatenate(pv_heads, axis=-1)                    # (TN, hd)
            acc = jnp.dot(o_all, wo_ref[...], preferred_element_type=jnp.float32)

        o_ref[0] = acc.astype(o_ref.dtype)

    return kernel


# ---------------------------------------------------------------------------
# Planning helpers
# ---------------------------------------------------------------------------
def _cdiv(a: int, b: int) -> int:
    return -(-a // b)


def _round_up(a: int, b: int) -> int:
    return _cdiv(a, b) * b


def _vmem_capacity_bytes() -> int:
    try:
        return int(pltpu.get_tpu_info().vmem_capacity_bytes)
    except Exception:
        return 64 * 1024 * 1024        # conservative: v7x per-TC VMEM


def _bf16_transcendentals_ok() -> bool:
    """True on chips with a bf16 EUP (v6e/v7x); keep exp in f32 elsewhere."""
    try:
        kind = jax.devices()[0].device_kind.lower()
    except Exception:
        return False
    return not any(t in kind for t in ("v2", "v3", "v4", "v5"))


def _plan_tiles(B, N, M, dim, hd, out_dim, itemsize):
    """Pick the N tile and vmem limit from actual buffer sizes + device VMEM."""
    sub = 16 if itemsize < 4 else 8          # bf16 packs 16 sublanes per vreg
    cap = _vmem_capacity_bytes()
    budget = int(cap * 0.7)                  # headroom for Mosaic scratch / spills

    # Resident buffers independent of the N tile:
    fixed = (2 * 2 * M * hd * itemsize       # K and V blocks, double-buffered
             + dim * hd * itemsize           # wq, single-buffered
             + hd * out_dim * itemsize)      # wo, single-buffered
    # Per-output-row bytes (x/out double-buffers + f32 temporaries q/s/p/acc):
    per_row = (2 * dim + 2 * out_dim) * itemsize + 4 * (2 * hd + 2 * M + out_dim)

    rows_fit = (budget - fixed) // per_row if budget > fixed else sub
    tn_cap = max(sub, (min(512, int(rows_fit)) // sub) * sub)

    if B == 1 and N > sub:
        # Keep >= 2 grid points along a 'parallel' axis so both TCs get work.
        tn_target = _round_up(_cdiv(N, 2), sub)
    else:
        tn_target = _round_up(N, sub)
    tn = min(tn_cap, tn_target)
    n_pad = _round_up(N, tn)

    need = fixed + tn * per_row
    vmem_limit = int(min(cap * 0.9, max(32 * 1024 * 1024, need * 3 // 2)))
    return tn, n_pad, vmem_limit


def _invariant_spec(shape, single_buffer: bool):
    """Grid-invariant (weight) BlockSpec, single-buffered when supported."""
    if single_buffer:
        try:
            return pl.BlockSpec(shape, lambda b, n: (0, 0),
                                pipeline_mode=pl.Buffered(buffer_count=1))
        except Exception:
            pass
    return pl.BlockSpec(shape, lambda b, n: (0, 0))


# ---------------------------------------------------------------------------
# Wrapper
# ---------------------------------------------------------------------------
def xattn_prepare_weights(wq, wk, wv, wo, head_dim: int):
    """One-time weight prep. Inputs are (in_dim, out_dim) = PyTorch weight.T.
    Folds the 1/sqrt(head_dim) softmax scale into the q projection."""
    scale = 1.0 / math.sqrt(head_dim)
    return (wq * scale).astype(wq.dtype), wk, wv, wo


def xattn_pallas(x, c, wq_scaled, wk, wv, wo, *, n_heads: int, head_dim: int):
    """x: (B, N, dim), c: (B, M, c_dim); weights (in_dim, out_dim); wq pre-scaled."""
    B, N, dim = x.shape
    Bc, M, c_dim = c.shape
    hd = n_heads * head_dim
    out_dim = wo.shape[1]
    assert Bc == B
    assert wq_scaled.shape == (dim, hd)
    assert wk.shape == (c_dim, hd) and wv.shape == (c_dim, hd)
    assert wo.shape == (hd, out_dim)
    assert x.dtype == c.dtype == wq_scaled.dtype == wk.dtype == wv.dtype == wo.dtype

    dtype = x.dtype
    itemsize = jnp.dtype(dtype).itemsize

    # Hoisted K/V projections (invariant along the N-tile axis): computed once
    # per call with plain XLA matmuls, not once per N tile inside the kernel.
    k = jnp.einsum("bmc,ch->bmh", c, wk)     # (B, M, hd)
    v = jnp.einsum("bmc,ch->bmh", c, wv)     # (B, M, hd)

    tn, n_pad, vmem_limit = _plan_tiles(B, N, M, dim, hd, out_dim, itemsize)
    x_p = jnp.pad(x, ((0, 0), (0, n_pad - N), (0, 0))) if n_pad != N else x

    fuse_o = (out_dim >= 512) and (hd >= 256)
    exp_bf16 = (dtype == jnp.bfloat16) and _bf16_transcendentals_ok()
    kernel = _make_xattn_kernel(n_heads, head_dim, fuse_o, exp_bf16)

    def _call(single_buffer_weights: bool):
        in_specs = [
            pl.BlockSpec((1, tn, dim), lambda b, n: (b, n, 0)),
            pl.BlockSpec((1, M, hd), lambda b, n: (b, 0, 0)),
            pl.BlockSpec((1, M, hd), lambda b, n: (b, 0, 0)),
            _invariant_spec((dim, hd), single_buffer_weights),
            _invariant_spec((hd, out_dim), single_buffer_weights),
        ]
        return pl.pallas_call(
            kernel,
            out_shape=jax.ShapeDtypeStruct((B, n_pad, out_dim), dtype),
            grid_spec=pltpu.PrefetchScalarGridSpec(
                num_scalar_prefetch=0,
                grid=(B, n_pad // tn),
                in_specs=in_specs,
                out_specs=pl.BlockSpec((1, tn, out_dim), lambda b, n: (b, n, 0)),
            ),
            compiler_params=pltpu.CompilerParams(
                dimension_semantics=("parallel", "parallel"),
                vmem_limit_bytes=vmem_limit,
            ),
        )(x_p, k, v, wq_scaled, wo)

    try:
        out = _call(True)
    except Exception:
        # Fallback if single-buffered (Buffered(1)) weight specs are unsupported.
        out = _call(False)

    if n_pad != N:
        out = out[:, :N, :]
    return out


# ---------------------------------------------------------------------------
# Pure-JAX reference (mirrors the PyTorch module, f32 math, unscaled wq)
# ---------------------------------------------------------------------------
def xattn_reference(x, c, wq, wk, wv, wo, *, n_heads: int, head_dim: int):
    x, c, wq, wk, wv, wo = (a.astype(jnp.float32) for a in (x, c, wq, wk, wv, wo))
    B, N, _ = x.shape
    _, M, _ = c.shape
    q = (x @ wq).reshape(B, N, n_heads, head_dim).transpose(0, 2, 1, 3)
    k = (c @ wk).reshape(B, M, n_heads, head_dim).transpose(0, 2, 1, 3)
    v = (c @ wv).reshape(B, M, n_heads, head_dim).transpose(0, 2, 1, 3)
    scores = jnp.einsum("bhnd,bhmd->bhnm", q, k)
    attn = jax.nn.softmax(scores / math.sqrt(head_dim), axis=-1)
    o = jnp.einsum("bhnm,bhmd->bhnd", attn, v)
    o = o.transpose(0, 2, 1, 3).reshape(B, N, n_heads * head_dim)
    return o @ wo


# ---------------------------------------------------------------------------
# Demo / self-test
# ---------------------------------------------------------------------------
def _run_case(name, *, B, N, M, dim, c_dim, out_dim, n_heads, head_dim,
              dtype, rtol, atol, key):
    hd = n_heads * head_dim
    ks = jax.random.split(key, 6)
    x = jax.random.normal(ks[0], (B, N, dim), dtype=jnp.float32)
    c = jax.random.normal(ks[1], (B, M, c_dim), dtype=jnp.float32)
    # Weights stored pre-transposed as (in_dim, out_dim), fan-in scaled.
    wq = jax.random.normal(ks[2], (dim, hd), jnp.float32) / math.sqrt(dim)
    wk = jax.random.normal(ks[3], (c_dim, hd), jnp.float32) / math.sqrt(c_dim)
    wv = jax.random.normal(ks[4], (c_dim, hd), jnp.float32) / math.sqrt(c_dim)
    wo = jax.random.normal(ks[5], (hd, out_dim), jnp.float32) / math.sqrt(hd)

    xd, cd, wqd, wkd, wvd, wod = (a.astype(dtype) for a in (x, c, wq, wk, wv, wo))
    wq_s, wk_p, wv_p, wo_p = xattn_prepare_weights(wqd, wkd, wvd, wod, head_dim)

    out = xattn_pallas(xd, cd, wq_s, wk_p, wv_p, wo_p,
                       n_heads=n_heads, head_dim=head_dim)
    out = jax.block_until_ready(out)

    ref = xattn_reference(xd, cd, wqd, wkd, wvd, wod,
                          n_heads=n_heads, head_dim=head_dim)
    np.testing.assert_allclose(np.asarray(out.astype(jnp.float32)),
                               np.asarray(ref), rtol=rtol, atol=atol,
                               err_msg=name)


if __name__ == "__main__":
    root = jax.random.PRNGKey(0)
    k1, k2, k3 = jax.random.split(root, 3)

    # Case 1: f32, small shapes, per-head o-projection path (out_dim < 512).
    _run_case("f32/per-head-o", B=2, N=8, M=16, dim=128, c_dim=128, out_dim=128,
              n_heads=4, head_dim=64, dtype=jnp.float32,
              rtol=2e-3, atol=2e-3, key=k1)

    # Case 2: bf16 operands (bf16 MXU inputs, f32 accumulation, bf16 exp where
    # supported); exercises the 16-sublane tile rounding / N-tail padding.
    _run_case("bf16/per-head-o", B=2, N=8, M=16, dim=128, c_dim=128, out_dim=128,
              n_heads=4, head_dim=64, dtype=jnp.bfloat16,
              rtol=5e-2, atol=5e-2, key=k2)

    # Case 3: larger out_dim -> fused single wide o-projection matmul; also
    # exercises the padded N tail (N=40) and the B==1 tile split for megacore.
    _run_case("f32/fused-o", B=1, N=40, M=32, dim=128, c_dim=128, out_dim=512,
              n_heads=8, head_dim=64, dtype=jnp.float32,
              rtol=5e-3, atol=5e-3, key=k3)

    print("KERNEL_OK")
</pallas_src>

<mosaic_0001>
module attributes {stable_mosaic.version = 11 : i64} {
  func.func @kernel(%arg0: i32, %arg1: i32, %arg2: memref<1x8x128xf32, #tpu.memory_space<vmem>>, %arg3: memref<1x16x256xf32, #tpu.memory_space<vmem>>, %arg4: memref<1x16x256xf32, #tpu.memory_space<vmem>>, %arg5: memref<128x256xf32, #tpu.memory_space<vmem>>, %arg6: memref<256x128xf32, #tpu.memory_space<vmem>>, %arg7: memref<1x8x128xf32, #tpu.memory_space<vmem>>) attributes {dimension_semantics = [#tpu.dimension_semantics<parallel>, #tpu.dimension_semantics<parallel>], iteration_bounds = array<i64: 2, 1>, scalar_prefetch = 0 : i64, scratch_operands = 0 : i64, tpu.core_type = #tpu.core_type<tc>, window_params = [{transform_indices = @transform_0, window_bounds = array<i64: 1, 8, 128>}, {transform_indices = @transform_1, window_bounds = array<i64: 1, 16, 256>}, {transform_indices = @transform_2, window_bounds = array<i64: 1, 16, 256>}, {pipeline_mode = #tpu.pipeline_mode<synchronous>, transform_indices = @transform_3, window_bounds = array<i64: 128, 256>}, {pipeline_mode = #tpu.pipeline_mode<synchronous>, transform_indices = @transform_4, window_bounds = array<i64: 256, 128>}, {transform_indices = @transform_5, window_bounds = array<i64: 1, 8, 128>}]} {
    %c0 = arith.constant 0 : index
    %c0_0 = arith.constant 0 : index
    %c0_1 = arith.constant 0 : index
    %0 = vector.load %arg2[%c0, %c0_0, %c0_1] : memref<1x8x128xf32, #tpu.memory_space<vmem>>, vector<1x8x128xf32>
    %1 = vector.shape_cast %0 : vector<1x8x128xf32> to vector<8x128xf32>
    %c0_2 = arith.constant 0 : index
    %c0_3 = arith.constant 0 : index
    %c0_4 = arith.constant 0 : index
    %2 = vector.load %arg3[%c0_2, %c0_3, %c0_4] : memref<1x16x256xf32, #tpu.memory_space<vmem>>, vector<1x16x256xf32>
    %3 = vector.shape_cast %2 : vector<1x16x256xf32> to vector<16x256xf32>
    %c0_5 = arith.constant 0 : index
    %c0_6 = arith.constant 0 : index
    %c0_7 = arith.constant 0 : index
    %4 = vector.load %arg4[%c0_5, %c0_6, %c0_7] : memref<1x16x256xf32, #tpu.memory_space<vmem>>, vector<1x16x256xf32>
    %5 = vector.shape_cast %4 : vector<1x16x256xf32> to vector<16x256xf32>
    %c0_8 = arith.constant 0 : index
    %c0_9 = arith.constant 0 : index
    %6 = vector.load %arg5[%c0_8, %c0_9] : memref<128x256xf32, #tpu.memory_space<vmem>>, vector<128x256xf32>
    %cst = arith.constant dense<0.000000e+00> : vector<8x256xf32>
    %7 = tpu.matmul %1, %6, %cst {dimension_numbers = #tpu.dot_dimension_numbers<[1], [0], [0], [1], [0, 0, 1, 1], [], []>} : vector<8x128xf32>, vector<128x256xf32>, vector<8x256xf32> -> vector<8x256xf32>
    %cst_10 = arith.constant 0.000000e+00 : f32
    %8 = vector.broadcast %cst_10 : f32 to vector<8x128xf32>
    %9 = vector.extract_strided_slice %7 {offsets = [0, 0], sizes = [8, 64], strides = [1, 1]} : vector<8x256xf32> to vector<8x64xf32>
    %10 = vector.extract_strided_slice %3 {offsets = [0, 0], sizes = [16, 64], strides = [1, 1]} : vector<16x256xf32> to vector<16x64xf32>
    %11 = vector.extract_strided_slice %5 {offsets = [0, 0], sizes = [16, 64], strides = [1, 1]} : vector<16x256xf32> to vector<16x64xf32>
    %cst_11 = arith.constant dense<0.000000e+00> : vector<8x16xf32>
    %12 = tpu.matmul %9, %10, %cst_11 {dimension_numbers = #tpu.dot_dimension_numbers<[1], [1], [0], [0], [0, 0, 1, 0], [], []>} : vector<8x64xf32>, vector<16x64xf32>, vector<8x16xf32> -> vector<8x16xf32>
    %cst_12 = arith.constant dense<0xFF800000> : vector<8xf32>
    %13 = vector.multi_reduction <maximumf>, %12, %cst_12 [1] : vector<8x16xf32> to vector<8xf32>
    %14 = vector.shape_cast %13 : vector<8xf32> to vector<8x1xf32>
    %15 = vector.broadcast %14 : vector<8x1xf32> to vector<8x16xf32>
    %16 = arith.subf %12, %15 : vector<8x16xf32>
    %17 = math.exp %16 : vector<8x16xf32>
    %cst_13 = arith.constant dense<0.000000e+00> : vector<8xf32>
    %18 = vector.multi_reduction <add>, %17, %cst_13 [1] : vector<8x16xf32> to vector<8xf32>
    %19 = vector.shape_cast %18 : vector<8xf32> to vector<8x1xf32>
    %cst_14 = arith.constant dense<0.000000e+00> : vector<8x64xf32>
    %20 = tpu.matmul %17, %11, %cst_14 {dimension_numbers = #tpu.dot_dimension_numbers<[1], [0], [0], [1], [0, 0, 1, 1], [], []>} : vector<8x16xf32>, vector<16x64xf32>, vector<8x64xf32> -> vector<8x64xf32>
    %cst_15 = arith.constant 1.000000e+00 : f32
    %21 = vector.broadcast %cst_15 : f32 to vector<8x1xf32>
    %22 = arith.divf %21, %19 : vector<8x1xf32>
    %23 = vector.broadcast %22 : vector<8x1xf32> to vector<8x64xf32>
    %24 = arith.mulf %20, %23 : vector<8x64xf32>
    %c0_16 = arith.constant 0 : index
    %c0_17 = arith.constant 0 : index
    %25 = vector.load %arg6[%c0_16, %c0_17] : memref<256x128xf32, #tpu.memory_space<vmem>>, vector<64x128xf32>
    %cst_18 = arith.constant dense<0.000000e+00> : vector<8x128xf32>
    %26 = tpu.matmul %24, %25, %cst_18 {dimension_numbers = #tpu.dot_dimension_numbers<[1], [0], [0], [1], [0, 0, 1, 1], [], []>} : vector<8x64xf32>, vector<64x128xf32>, vector<8x128xf32> -> vector<8x128xf32>
    %27 = arith.addf %8, %26 : vector<8x128xf32>
    %28 = vector.extract_strided_slice %7 {offsets = [0, 64], sizes = [8, 64], strides = [1, 1]} : vector<8x256xf32> to vector<8x64xf32>
    %29 = vector.extract_strided_slice %3 {offsets = [0, 64], sizes = [16, 64], strides = [1, 1]} : vector<16x256xf32> to vector<16x64xf32>
    %30 = vector.extract_strided_slice %5 {offsets = [0, 64], sizes = [16, 64], strides = [1, 1]} : vector<16x256xf32> to vector<16x64xf32>
    %cst_19 = arith.constant dense<0.000000e+00> : vector<8x16xf32>
    %31 = tpu.matmul %28, %29, %cst_19 {dimension_numbers = #tpu.dot_dimension_numbers<[1], [1], [0], [0], [0, 0, 1, 0], [], []>} : vector<8x64xf32>, vector<16x64xf32>, vector<8x16xf32> -> vector<8x16xf32>
    %cst_20 = arith.constant dense<0xFF800000> : vector<8xf32>
    %32 = vector.multi_reduction <maximumf>, %31, %cst_20 [1] : vector<8x16xf32> to vector<8xf32>
    %33 = vector.shape_cast %32 : vector<8xf32> to vector<8x1xf32>
    %34 = vector.broadcast %33 : vector<8x1xf32> to vector<8x16xf32>
    %35 = arith.subf %31, %34 : vector<8x16xf32>
    %36 = math.exp %35 : vector<8x16xf32>
    %cst_21 = arith.constant dense<0.000000e+00> : vector<8xf32>
    %37 = vector.multi_reduction <add>, %36, %cst_21 [1] : vector<8x16xf32> to vector<8xf32>
    %38 = vector.shape_cast %37 : vector<8xf32> to vector<8x1xf32>
    %cst_22 = arith.constant dense<0.000000e+00> : vector<8x64xf32>
    %39 = tpu.matmul %36, %30, %cst_22 {dimension_numbers = #tpu.dot_dimension_numbers<[1], [0], [0], [1], [0, 0, 1, 1], [], []>} : vector<8x16xf32>, vector<16x64xf32>, vector<8x64xf32> -> vector<8x64xf32>
    %cst_23 = arith.constant 1.000000e+00 : f32
    %40 = vector.broadcast %cst_23 : f32 to vector<8x1xf32>
    %41 = arith.divf %40, %38 : vector<8x1xf32>
    %42 = vector.broadcast %41 : vector<8x1xf32> to vector<8x64xf32>
    %43 = arith.mulf %39, %42 : vector<8x64xf32>
    %c64 = arith.constant 64 : index
    %c0_24 = arith.constant 0 : index
    %44 = vector.load %arg6[%c64, %c0_24] : memref<256x128xf32, #tpu.memory_space<vmem>>, vector<64x128xf32>
    %cst_25 = arith.constant dense<0.000000e+00> : vector<8x128xf32>
    %45 = tpu.matmul %43, %44, %cst_25 {dimension_numbers = #tpu.dot_dimension_numbers<[1], [0], [0], [1], [0, 0, 1, 1], [], []>} : vector<8x64xf32>, vector<64x128xf32>, vector<8x128xf32> -> vector<8x128xf32>
    %46 = arith.addf %27, %45 : vector<8x128xf32>
    %47 = vector.extract_strided_slice %7 {offsets = [0, 128], sizes = [8, 64], strides = [1, 1]} : vector<8x256xf32> to vector<8x64xf32>
    %48 = vector.extract_strided_slice %3 {offsets = [0, 128], sizes = [16, 64], strides = [1, 1]} : vector<16x256xf32> to vector<16x64xf32>
    %49 = vector.extract_strided_slice %5 {offsets = [0, 128], sizes = [16, 64], strides = [1, 1]} : vector<16x256xf32> to vector<16x64xf32>
    %cst_26 = arith.constant dense<0.000000e+00> : vector<8x16xf32>
    %50 = tpu.matmul %47, %48, %cst_26 {dimension_numbers = #tpu.dot_dimension_numbers<[1], [1], [0], [0], [0, 0, 1, 0], [], []>} : vector<8x64xf32>, vector<16x64xf32>, vector<8x16xf32> -> vector<8x16xf32>
    %cst_27 = arith.constant dense<0xFF800000> : vector<8xf32>
    %51 = vector.multi_reduction <maximumf>, %50, %cst_27 [1] : vector<8x16xf32> to vector<8xf32>
    %52 = vector.shape_cast %51 : vector<8xf32> to vector<8x1xf32>
    %53 = vector.broadcast %52 : vector<8x1xf32> to vector<8x16xf32>
    %54 = arith.subf %50, %53 : vector<8x16xf32>
    %55 = math.exp %54 : vector<8x16xf32>
    %cst_28 = arith.constant dense<0.000000e+00> : vector<8xf32>
    %56 = vector.multi_reduction <add>, %55, %cst_28 [1] : vector<8x16xf32> to vector<8xf32>
    %57 = vector.shape_cast %56 : vector<8xf32> to vector<8x1xf32>
    %cst_29 = arith.constant dense<0.000000e+00> : vector<8x64xf32>
    %58 = tpu.matmul %55, %49, %cst_29 {dimension_numbers = #tpu.dot_dimension_numbers<[1], [0], [0], [1], [0, 0, 1, 1], [], []>} : vector<8x16xf32>, vector<16x64xf32>, vector<8x64xf32> -> vector<8x64xf32>
    %cst_30 = arith.constant 1.000000e+00 : f32
    %59 = vector.broadcast %cst_30 : f32 to vector<8x1xf32>
    %60 = arith.divf %59, %57 : vector<8x1xf32>
    %61 = vector.broadcast %60 : vector<8x1xf32> to vector<8x64xf32>
    %62 = arith.mulf %58, %61 : vector<8x64xf32>
    %c128 = arith.constant 128 : index
    %c0_31 = arith.constant 0 : index
    %63 = vector.load %arg6[%c128, %c0_31] : memref<256x128xf32, #tpu.memory_space<vmem>>, vector<64x128xf32>
    %cst_32 = arith.constant dense<0.000000e+00> : vector<8x128xf32>
    %64 = tpu.matmul %62, %63, %cst_32 {dimension_numbers = #tpu.dot_dimension_numbers<[1], [0], [0], [1], [0, 0, 1, 1], [], []>} : vector<8x64xf32>, vector<64x128xf32>, vector<8x128xf32> -> vector<8x128xf32>
    %65 = arith.addf %46, %64 : vector<8x128xf32>
    %66 = vector.extract_strided_slice %7 {offsets = [0, 192], sizes = [8, 64], strides = [1, 1]} : vector<8x256xf32> to vector<8x64xf32>
    %67 = vector.extract_strided_slice %3 {offsets = [0, 192], sizes = [16, 64], strides = [1, 1]} : vector<16x256xf32> to vector<16x64xf32>
    %68 = vector.extract_strided_slice %5 {offsets = [0, 192], sizes = [16, 64], strides = [1, 1]} : vector<16x256xf32> to vector<16x64xf32>
    %cst_33 = arith.constant dense<0.000000e+00> : vector<8x16xf32>
    %69 = tpu.matmul %66, %67, %cst_33 {dimension_numbers = #tpu.dot_dimension_numbers<[1], [1], [0], [0], [0, 0, 1, 0], [], []>} : vector<8x64xf32>, vector<16x64xf32>, vector<8x16xf32> -> vector<8x16xf32>
    %cst_34 = arith.constant dense<0xFF800000> : vector<8xf32>
    %70 = vector.multi_reduction <maximumf>, %69, %cst_34 [1] : vector<8x16xf32> to vector<8xf32>
    %71 = vector.shape_cast %70 : vector<8xf32> to vector<8x1xf32>
    %72 = vector.broadcast %71 : vector<8x1xf32> to vector<8x16xf32>
    %73 = arith.subf %69, %72 : vector<8x16xf32>
    %74 = math.exp %73 : vector<8x16xf32>
    %cst_35 = arith.constant dense<0.000000e+00> : vector<8xf32>
    %75 = vector.multi_reduction <add>, %74, %cst_35 [1] : vector<8x16xf32> to vector<8xf32>
    %76 = vector.shape_cast %75 : vector<8xf32> to vector<8x1xf32>
    %cst_36 = arith.constant dense<0.000000e+00> : vector<8x64xf32>
    %77 = tpu.matmul %74, %68, %cst_36 {dimension_numbers = #tpu.dot_dimension_numbers<[1], [0], [0], [1], [0, 0, 1, 1], [], []>} : vector<8x16xf32>, vector<16x64xf32>, vector<8x64xf32> -> vector<8x64xf32>
    %cst_37 = arith.constant 1.000000e+00 : f32
    %78 = vector.broadcast %cst_37 : f32 to vector<8x1xf32>
    %79 = arith.divf %78, %76 : vector<8x1xf32>
    %80 = vector.broadcast %79 : vector<8x1xf32> to vector<8x64xf32>
    %81 = arith.mulf %77, %80 : vector<8x64xf32>
    %c192 = arith.constant 192 : index
    %c0_38 = arith.constant 0 : index
    %82 = vector.load %arg6[%c192, %c0_38] : memref<256x128xf32, #tpu.memory_space<vmem>>, vector<64x128xf32>
    %cst_39 = arith.constant dense<0.000000e+00> : vector<8x128xf32>
    %83 = tpu.matmul %81, %82, %cst_39 {dimension_numbers = #tpu.dot_dimension_numbers<[1], [0], [0], [1], [0, 0, 1, 1], [], []>} : vector<8x64xf32>, vector<64x128xf32>, vector<8x128xf32> -> vector<8x128xf32>
    %84 = arith.addf %65, %83 : vector<8x128xf32>
    %c0_40 = arith.constant 0 : index
    %c0_41 = arith.constant 0 : index
    %c0_42 = arith.constant 0 : index
    %85 = vector.load %arg7[%c0_40, %c0_41, %c0_42] : memref<1x8x128xf32, #tpu.memory_space<vmem>>, vector<1x8x128xf32>
    %86 = vector.shape_cast %85 : vector<1x8x128xf32> to vector<8x128xf32>
    %87 = vector.shape_cast %84 : vector<8x128xf32> to vector<1x8x128xf32>
    tpu.vector_store %arg7[%c0_40, %c0_41, %c0_42], %87 {strides = array<i32>} : memref<1x8x128xf32, #tpu.memory_space<vmem>>, vector<1x8x128xf32>,
    return
  }
  func.func @transform_0(%arg0: i32, %arg1: i32) -> (i32, i32, i32) {
    %c0_i32 = arith.constant 0 : i32
    %c0_i32_0 = arith.constant 0 : i32
    return %arg0, %arg1, %c0_i32 : i32, i32, i32
  }
  func.func @transform_1(%arg0: i32, %arg1: i32) -> (i32, i32, i32) {
    %c0_i32 = arith.constant 0 : i32
    %c0_i32_0 = arith.constant 0 : i32
    %c0_i32_1 = arith.constant 0 : i32
    return %arg0, %c0_i32, %c0_i32_0 : i32, i32, i32
  }
  func.func @transform_2(%arg0: i32, %arg1: i32) -> (i32, i32, i32) {
    %c0_i32 = arith.constant 0 : i32
    %c0_i32_0 = arith.constant 0 : i32
    %c0_i32_1 = arith.constant 0 : i32
    return %arg0, %c0_i32, %c0_i32_0 : i32, i32, i32
  }
  func.func @transform_3(%arg0: i32, %arg1: i32) -> (i32, i32) {
    %c0_i32 = arith.constant 0 : i32
    %c0_i32_0 = arith.constant 0 : i32
    %c0_i32_1 = arith.constant 0 : i32
    return %c0_i32, %c0_i32_0 : i32, i32
  }
  func.func @transform_4(%arg0: i32, %arg1: i32) -> (i32, i32) {
    %c0_i32 = arith.constant 0 : i32
    %c0_i32_0 = arith.constant 0 : i32
    %c0_i32_1 = arith.constant 0 : i32
    return %c0_i32, %c0_i32_0 : i32, i32
  }
  func.func @transform_5(%arg0: i32, %arg1: i32) -> (i32, i32, i32) {
    %c0_i32 = arith.constant 0 : i32
    %c0_i32_0 = arith.constant 0 : i32
    return %arg0, %arg1, %c0_i32 : i32, i32, i32
  }
}

module attributes {stable_mosaic.version = 11 : i64} {
  func.func @kernel(%arg0: i32, %arg1: i32, %arg2: memref<1x8x128xf32, #tpu.memory_space<vmem>>, %arg3: memref<1x16x256xf32, #tpu.memory_space<vmem>>, %arg4: memref<1x16x256xf32, #tpu.memory_space<vmem>>, %arg5: memref<128x256xf32, #tpu.memory_space<vmem>>, %arg6: memref<256x128xf32, #tpu.memory_space<vmem>>, %arg7: memref<1x8x128xf32, #tpu.memory_space<vmem>>) attributes {dimension_semantics = [#tpu.dimension_semantics<parallel>, #tpu.dimension_semantics<parallel>], iteration_bounds = array<i64: 2, 1>, scalar_prefetch = 0 : i64, scratch_operands = 0 : i64, tpu.core_type = #tpu.core_type<tc>, window_params = [{transform_indices = @transform_0, window_bounds = array<i64: 1, 8, 128>}, {transform_indices = @transform_1, window_bounds = array<i64: 1, 16, 256>}, {transform_indices = @transform_2, window_bounds = array<i64: 1, 16, 256>}, {pipeline_mode = #tpu.pipeline_mode<synchronous>, transform_indices = @transform_3, window_bounds = array<i64: 128, 256>}, {pipeline_mode = #tpu.pipeline_mode<synchronous>, transform_indices = @transform_4, window_bounds = array<i64: 256, 128>}, {transform_indices = @transform_5, window_bounds = array<i64: 1, 8, 128>}]} {
    %c0 = arith.constant 0 : index
    %c0_0 = arith.constant 0 : index
    %c0_1 = arith.constant 0 : index
    %0 = vector.load %arg2[%c0, %c0_0, %c0_1] : memref<1x8x128xf32, #tpu.memory_space<vmem>>, vector<1x8x128xf32>
    %1 = vector.shape_cast %0 : vector<1x8x128xf32> to vector<8x128xf32>
    %c0_2 = arith.constant 0 : index
    %c0_3 = arith.constant 0 : index
    %c0_4 = arith.constant 0 : index
    %2 = vector.load %arg3[%c0_2, %c0_3, %c0_4] : memref<1x16x256xf32, #tpu.memory_space<vmem>>, vector<1x16x256xf32>
    %3 = vector.shape_cast %2 : vector<1x16x256xf32> to vector<16x256xf32>
    %c0_5 = arith.constant 0 : index
    %c0_6 = arith.constant 0 : index
    %c0_7 = arith.constant 0 : index
    %4 = vector.load %arg4[%c0_5, %c0_6, %c0_7] : memref<1x16x256xf32, #tpu.memory_space<vmem>>, vector<1x16x256xf32>
    %5 = vector.shape_cast %4 : vector<1x16x256xf32> to vector<16x256xf32>
    %c0_8 = arith.constant 0 : index
    %c0_9 = arith.constant 0 : index
    %6 = vector.load %arg5[%c0_8, %c0_9] : memref<128x256xf32, #tpu.memory_space<vmem>>, vector<128x256xf32>
    %cst = arith.constant dense<0.000000e+00> : vector<8x256xf32>
    %7 = tpu.matmul %1, %6, %cst {dimension_numbers = #tpu.dot_dimension_numbers<[1], [0], [0], [1], [0, 0, 1, 1], [], []>} : vector<8x128xf32>, vector<128x256xf32>, vector<8x256xf32> -> vector<8x256xf32>
    %cst_10 = arith.constant 0.000000e+00 : f32
    %8 = vector.broadcast %cst_10 : f32 to vector<8x128xf32>
    %9 = vector.extract_strided_slice %7 {offsets = [0, 0], sizes = [8, 64], strides = [1, 1]} : vector<8x256xf32> to vector<8x64xf32>
    %10 = vector.extract_strided_slice %3 {offsets = [0, 0], sizes = [16, 64], strides = [1, 1]} : vector<16x256xf32> to vector<16x64xf32>
    %11 = vector.extract_strided_slice %5 {offsets = [0, 0], sizes = [16, 64], strides = [1, 1]} : vector<16x256xf32> to vector<16x64xf32>
    %cst_11 = arith.constant dense<0.000000e+00> : vector<8x16xf32>
    %12 = tpu.matmul %9, %10, %cst_11 {dimension_numbers = #tpu.dot_dimension_numbers<[1], [1], [0], [0], [0, 0, 1, 0], [], []>} : vector<8x64xf32>, vector<16x64xf32>, vector<8x16xf32> -> vector<8x16xf32>
    %cst_12 = arith.constant dense<0xFF800000> : vector<8xf32>
    %13 = vector.multi_reduction <maximumf>, %12, %cst_12 [1] : vector<8x16xf32> to vector<8xf32>
    %14 = vector.shape_cast %13 : vector<8xf32> to vector<8x1xf32>
    %15 = vector.broadcast %14 : vector<8x1xf32> to vector<8x16xf32>
    %16 = arith.subf %12, %15 : vector<8x16xf32>
    %17 = math.exp %16 : vector<8x16xf32>
    %cst_13 = arith.constant dense<0.000000e+00> : vector<8xf32>
    %18 = vector.multi_reduction <add>, %17, %cst_13 [1] : vector<8x16xf32> to vector<8xf32>
    %19 = vector.shape_cast %18 : vector<8xf32> to vector<8x1xf32>
    %cst_14 = arith.constant dense<0.000000e+00> : vector<8x64xf32>
    %20 = tpu.matmul %17, %11, %cst_14 {dimension_numbers = #tpu.dot_dimension_numbers<[1], [0], [0], [1], [0, 0, 1, 1], [], []>} : vector<8x16xf32>, vector<16x64xf32>, vector<8x64xf32> -> vector<8x64xf32>
    %cst_15 = arith.constant 1.000000e+00 : f32
    %21 = vector.broadcast %cst_15 : f32 to vector<8x1xf32>
    %22 = arith.divf %21, %19 : vector<8x1xf32>
    %23 = vector.broadcast %22 : vector<8x1xf32> to vector<8x64xf32>
    %24 = arith.mulf %20, %23 : vector<8x64xf32>
    %c0_16 = arith.constant 0 : index
    %c0_17 = arith.constant 0 : index
    %25 = vector.load %arg6[%c0_16, %c0_17] : memref<256x128xf32, #tpu.memory_space<vmem>>, vector<64x128xf32>
    %cst_18 = arith.constant dense<0.000000e+00> : vector<8x128xf32>
    %26 = tpu.matmul %24, %25, %cst_18 {dimension_numbers = #tpu.dot_dimension_numbers<[1], [0], [0], [1], [0, 0, 1, 1], [], []>} : vector<8x64xf32>, vector<64x128xf32>, vector<8x128xf32> -> vector<8x128xf32>
    %27 = arith.addf %8, %26 : vector<8x128xf32>
    %28 = vector.extract_strided_slice %7 {offsets = [0, 64], sizes = [8, 64], strides = [1, 1]} : vector<8x256xf32> to vector<8x64xf32>
    %29 = vector.extract_strided_slice %3 {offsets = [0, 64], sizes = [16, 64], strides = [1, 1]} : vector<16x256xf32> to vector<16x64xf32>
    %30 = vector.extract_strided_slice %5 {offsets = [0, 64], sizes = [16, 64], strides = [1, 1]} : vector<16x256xf32> to vector<16x64xf32>
    %cst_19 = arith.constant dense<0.000000e+00> : vector<8x16xf32>
    %31 = tpu.matmul %28, %29, %cst_19 {dimension_numbers = #tpu.dot_dimension_numbers<[1], [1], [0], [0], [0, 0, 1, 0], [], []>} : vector<8x64xf32>, vector<16x64xf32>, vector<8x16xf32> -> vector<8x16xf32>
    %cst_20 = arith.constant dense<0xFF800000> : vector<8xf32>
    %32 = vector.multi_reduction <maximumf>, %31, %cst_20 [1] : vector<8x16xf32> to vector<8xf32>
    %33 = vector.shape_cast %32 : vector<8xf32> to vector<8x1xf32>
    %34 = vector.broadcast %33 : vector<8x1xf32> to vector<8x16xf32>
    %35 = arith.subf %31, %34 : vector<8x16xf32>
    %36 = math.exp %35 : vector<8x16xf32>
    %cst_21 = arith.constant dense<0.000000e+00> : vector<8xf32>
    %37 = vector.multi_reduction <add>, %36, %cst_21 [1] : vector<8x16xf32> to vector<8xf32>
    %38 = vector.shape_cast %37 : vector<8xf32> to vector<8x1xf32>
    %cst_22 = arith.constant dense<0.000000e+00> : vector<8x64xf32>
    %39 = tpu.matmul %36, %30, %cst_22 {dimension_numbers = #tpu.dot_dimension_numbers<[1], [0], [0], [1], [0, 0, 1, 1], [], []>} : vector<8x16xf32>, vector<16x64xf32>, vector<8x64xf32> -> vector<8x64xf32>
    %cst_23 = arith.constant 1.000000e+00 : f32
    %40 = vector.broadcast %cst_23 : f32 to vector<8x1xf32>
    %41 = arith.divf %40, %38 : vector<8x1xf32>
    %42 = vector.broadcast %41 : vector<8x1xf32> to vector<8x64xf32>
    %43 = arith.mulf %39, %42 : vector<8x64xf32>
    %c64 = arith.constant 64 : index
    %c0_24 = arith.constant 0 : index
    %44 = vector.load %arg6[%c64, %c0_24] : memref<256x128xf32, #tpu.memory_space<vmem>>, vector<64x128xf32>
    %cst_25 = arith.constant dense<0.000000e+00> : vector<8x128xf32>
    %45 = tpu.matmul %43, %44, %cst_25 {dimension_numbers = #tpu.dot_dimension_numbers<[1], [0], [0], [1], [0, 0, 1, 1], [], []>} : vector<8x64xf32>, vector<64x128xf32>, vector<8x128xf32> -> vector<8x128xf32>
    %46 = arith.addf %27, %45 : vector<8x128xf32>
    %47 = vector.extract_strided_slice %7 {offsets = [0, 128], sizes = [8, 64], strides = [1, 1]} : vector<8x256xf32> to vector<8x64xf32>
    %48 = vector.extract_strided_slice %3 {offsets = [0, 128], sizes = [16, 64], strides = [1, 1]} : vector<16x256xf32> to vector<16x64xf32>
    %49 = vector.extract_strided_slice %5 {offsets = [0, 128], sizes = [16, 64], strides = [1, 1]} : vector<16x256xf32> to vector<16x64xf32>
    %cst_26 = arith.constant dense<0.000000e+00> : vector<8x16xf32>
    %50 = tpu.matmul %47, %48, %cst_26 {dimension_numbers = #tpu.dot_dimension_numbers<[1], [1], [0], [0], [0, 0, 1, 0], [], []>} : vector<8x64xf32>, vector<16x64xf32>, vector<8x16xf32> -> vector<8x16xf32>
    %cst_27 = arith.constant dense<0xFF800000> : vector<8xf32>
    %51 = vector.multi_reduction <maximumf>, %50, %cst_27 [1] : vector<8x16xf32> to vector<8xf32>
    %52 = vector.shape_cast %51 : vector<8xf32> to vector<8x1xf32>
    %53 = vector.broadcast %52 : vector<8x1xf32> to vector<8x16xf32>
    %54 = arith.subf %50, %53 : vector<8x16xf32>
    %55 = math.exp %54 : vector<8x16xf32>
    %cst_28 = arith.constant dense<0.000000e+00> : vector<8xf32>
    %56 = vector.multi_reduction <add>, %55, %cst_28 [1] : vector<8x16xf32> to vector<8xf32>
    %57 = vector.shape_cast %56 : vector<8xf32> to vector<8x1xf32>
    %cst_29 = arith.constant dense<0.000000e+00> : vector<8x64xf32>
    %58 = tpu.matmul %55, %49, %cst_29 {dimension_numbers = #tpu.dot_dimension_numbers<[1], [0], [0], [1], [0, 0, 1, 1], [], []>} : vector<8x16xf32>, vector<16x64xf32>, vector<8x64xf32> -> vector<8x64xf32>
    %cst_30 = arith.constant 1.000000e+00 : f32
    %59 = vector.broadcast %cst_30 : f32 to vector<8x1xf32>
    %60 = arith.divf %59, %57 : vector<8x1xf32>
    %61 = vector.broadcast %60 : vector<8x1xf32> to vector<8x64xf32>
    %62 = arith.mulf %58, %61 : vector<8x64xf32>
    %c128 = arith.constant 128 : index
    %c0_31 = arith.constant 0 : index
    %63 = vector.load %arg6[%c128, %c0_31] : memref<256x128xf32, #tpu.memory_space<vmem>>, vector<64x128xf32>
    %cst_32 = arith.constant dense<0.000000e+00> : vector<8x128xf32>
    %64 = tpu.matmul %62, %63, %cst_32 {dimension_numbers = #tpu.dot_dimension_numbers<[1], [0], [0], [1], [0, 0, 1, 1], [], []>} : vector<8x64xf32>, vector<64x128xf32>, vector<8x128xf32> -> vector<8x128xf32>
    %65 = arith.addf %46, %64 : vector<8x128xf32>
    %66 = vector.extract_strided_slice %7 {offsets = [0, 192], sizes = [8, 64], strides = [1, 1]} : vector<8x256xf32> to vector<8x64xf32>
    %67 = vector.extract_strided_slice %3 {offsets = [0, 192], sizes = [16, 64], strides = [1, 1]} : vector<16x256xf32> to vector<16x64xf32>
    %68 = vector.extract_strided_slice %5 {offsets = [0, 192], sizes = [16, 64], strides = [1, 1]} : vector<16x256xf32> to vector<16x64xf32>
    %cst_33 = arith.constant dense<0.000000e+00> : vector<8x16xf32>
    %69 = tpu.matmul %66, %67, %cst_33 {dimension_numbers = #tpu.dot_dimension_numbers<[1], [1], [0], [0], [0, 0, 1, 0], [], []>} : vector<8x64xf32>, vector<16x64xf32>, vector<8x16xf32> -> vector<8x16xf32>
    %cst_34 = arith.constant dense<0xFF800000> : vector<8xf32>
    %70 = vector.multi_reduction <maximumf>, %69, %cst_34 [1] : vector<8x16xf32> to vector<8xf32>
    %71 = vector.shape_cast %70 : vector<8xf32> to vector<8x1xf32>
    %72 = vector.broadcast %71 : vector<8x1xf32> to vector<8x16xf32>
    %73 = arith.subf %69, %72 : vector<8x16xf32>
    %74 = math.exp %73 : vector<8x16xf32>
    %cst_35 = arith.constant dense<0.000000e+00> : vector<8xf32>
    %75 = vector.multi_reduction <add>, %74, %cst_35 [1] : vector<8x16xf32> to vector<8xf32>
    %76 = vector.shape_cast %75 : vector<8xf32> to vector<8x1xf32>
    %cst_36 = arith.constant dense<0.000000e+00> : vector<8x64xf32>
    %77 = tpu.matmul %74, %68, %cst_36 {dimension_numbers = #tpu.dot_dimension_numbers<[1], [0], [0], [1], [0, 0, 1, 1], [], []>} : vector<8x16xf32>, vector<16x64xf32>, vector<8x64xf32> -> vector<8x64xf32>
    %cst_37 = arith.constant 1.000000e+00 : f32
    %78 = vector.broadcast %cst_37 : f32 to vector<8x1xf32>
    %79 = arith.divf %78, %76 : vector<8x1xf32>
    %80 = vector.broadcast %79 : vector<8x1xf32> to vector<8x64xf32>
    %81 = arith.mulf %77, %80 : vector<8x64xf32>
    %c192 = arith.constant 192 : index
    %c0_38 = arith.constant 0 : index
    %82 = vector.load %arg6[%c192, %c0_38] : memref<256x128xf32, #tpu.memory_space<vmem>>, vector<64x128xf32>
    %cst_39 = arith.constant dense<0.000000e+00> : vector<8x128xf32>
    %83 = tpu.matmul %81, %82, %cst_39 {dimension_numbers = #tpu.dot_dimension_numbers<[1], [0], [0], [1], [0, 0, 1, 1], [], []>} : vector<8x64xf32>, vector<64x128xf32>, vector<8x128xf32> -> vector<8x128xf32>
    %84 = arith.addf %65, %83 : vector<8x128xf32>
    %c0_40 = arith.constant 0 : index
    %c0_41 = arith.constant 0 : index
    %c0_42 = arith.constant 0 : index
    %85 = vector.load %arg7[%c0_40, %c0_41, %c0_42] : memref<1x8x128xf32, #tpu.memory_space<vmem>>, vector<1x8x128xf32>
    %86 = vector.shape_cast %85 : vector<1x8x128xf32> to vector<8x128xf32>
    %87 = vector.shape_cast %84 : vector<8x128xf32> to vector<1x8x128xf32>
    tpu.vector_store %arg7[%c0_40, %c0_41, %c0_42], %87 {strides = array<i32>} : memref<1x8x128xf32, #tpu.memory_space<vmem>>, vector<1x8x128xf32>,
    return
  }
  func.func @transform_0(%arg0: i32, %arg1: i32) -> (i32, i32, i32) {
    %c0_i32 = arith.constant 0 : i32
    %c0_i32_0 = arith.constant 0 : i32
    return %arg0, %arg1, %c0_i32 : i32, i32, i32
  }
  func.func @transform_1(%arg0: i32, %arg1: i32) -> (i32, i32, i32) {
    %c0_i32 = arith.constant 0 : i32
    %c0_i32_0 = arith.constant 0 : i32
    %c0_i32_1 = arith.constant 0 : i32
    return %arg0, %c0_i32, %c0_i32_0 : i32, i32, i32
  }
  func.func @transform_2(%arg0: i32, %arg1: i32) -> (i32, i32, i32) {
    %c0_i32 = arith.constant 0 : i32
    %c0_i32_0 = arith.constant 0 : i32
    %c0_i32_1 = arith.constant 0 : i32
    return %arg0, %c0_i32, %c0_i32_0 : i32, i32, i32
  }
  func.func @transform_3(%arg0: i32, %arg1: i32) -> (i32, i32) {
    %c0_i32 = arith.constant 0 : i32
    %c0_i32_0 = arith.constant 0 : i32
    %c0_i32_1 = arith.constant 0 : i32
    return %c0_i32, %c0_i32_0 : i32, i32
  }
  func.func @transform_4(%arg0: i32, %arg1: i32) -> (i32, i32) {
    %c0_i32 = arith.constant 0 : i32
    %c0_i32_0 = arith.constant 0 : i32
    %c0_i32_1 = arith.constant 0 : i32
    return %c0_i32, %c0_i32_0 : i32, i32
  }
  func.func @transform_5(%arg0: i32, %arg1: i32) -> (i32, i32, i32) {
    %c0_i32 = arith.constant 0 : i32
    %c0_i32_0 = arith.constant 0 : i32
    return %arg0, %arg1, %c0_i32 : i32, i32, i32
  }
}

</mosaic_0001>

<bundles_post_ra>
// kernel: tpu_custom_call.1
= control target key start
LH: loop header
LB: loop body
LE: loop exit
PB: predicated region body
PF: predicated region fallthrough
CT: control target
= control target key end

     0   :  { %s2880_s0 = inlined_call_operand.hbm [shape: f32[2,8,128], index: 0, kind: input, shape index: {}]   ;;  %s2881_s1 = inlined_call_operand.hbm [shape: f32[2,16,256], index: 1, kind: input, shape index: {}]   ;;  %s2882_s2 = inlined_call_operand.hbm [shape: f32[2,16,256], index: 2, kind: input, shape index: {}]   ;;  %s2883_s3 = inlined_call_operand.hbm [shape: f32[128,256], index: 3, kind: input, shape index: {}]   ;;  %s2884_s4 = inlined_call_operand.hbm [shape: f32[256,128], index: 4, kind: input, shape index: {}]   ;;  %s2885_s5 = inlined_call_operand.hbm [shape: f32[2,8,128], index: 5, kind: output, shape index: {}]  }
   0x1   :  { %2910 = sst [smem:[#allocation24_spill]] %s2881_s1 }
   0x2   :  { %2911 = sst [smem:[#allocation25_spill]] %s2883_s3 }
   0x3   :  { %2912 = sst [smem:[#allocation26_spill]] %s2885_s5 }
   0x4   :  { %10 = vsyncpa [#allocation3], 0 }
   0x5   :  { %12 = vsyncpa [#allocation3 + $0x1], 0 }
   0x6   :  { %13 = vsyncpa [#allocation6], 0 }
   0x7   :  { %15 = vsyncpa [#allocation6 + $0x1], 0 }
   0x8   :  { %16 = vsyncpa [#allocation9], 0 }
   0x9   :  { %17 = vsyncpa [#allocation4], 0 }
   0xa   :  { %19 = vsyncpa [#allocation4 + $0x1], 0  ;;  %s2410_s18 = smov 0   ;;  %s2412_s19 = smov 0  }
   0xb   :  { %s2414_s20 = smov 0   ;;  %s2416_s21 = smov 0  }
   0xc   :  { %s2418_s22 = smov 0   ;;  %s2420_s23 = smov 0  }
   0xd LB: > { %2913 = sst [smem:[#allocation16_spill]] %s2344_s18  ;;  %s2441_s24 = sadd.s32 4294967295, %s2364_s23   ;;  %s2364_s23 = sphi %s2420_s23, %s25_s23   ;;  %s2360_s22 = sphi %s2418_s22, %s2963_s22   ;;  %s2356_s21 = sphi %s2416_s21, %s2962_s21   ;;  %s2352_s20 = sphi %s2414_s20, %s2958_s20   ;;  %s2348_s19 = sphi %s2412_s19, %s2961_s19   ;;  %s2344_s18 = sphi %s2410_s18, %s2960_s18  }
   0xe   : > { %2914 = sst [smem:[#allocation17_spill]] %s2352_s20  ;;  %s1640_s25 = sadd.s32 4294967294, %s2364_s23  }
   0xf   : > { %2915 = sst [smem:[#allocation18_spill]] %s2356_s21  ;;  %p53_p0 = scmp.ne.s32.totalorder %s2352_s20, %s2348_s19 }
  0x10   : > { %2916 = sst [smem:[#allocation19_spill]] %s2364_s23  ;;  %p54_p1 = scmp.eq.s32.totalorder %s2364_s23, 0 }
  0x11   : > { %p59_p2 = scmp.ne.s32.totalorder %s2348_s19, %s2344_s18  ;;  %p2886_p3 = scmp.eq.s32.totalorder %s2441_s24, 0 }
  0x12   : > { %p179_p4 = scmp.eq.s32.totalorder %s2441_s24, 1  ;;  %p2452_p5 = por %p54_p1, %p53_p0 }
  0x13   : > { %p185_p6 = scmp.eq.s32.totalorder %s1640_s25, 1  ;;  %p2458_p7 = por %p2886_p3, %p59_p2 }
  0x14   : > { %p2462_p8 = por %p179_p4, %p53_p0  ;;  %p1641_p10 = scmp.ge.s32.totalorder %s2364_s23, 1 }
  0x15   : > { %s2918_s28 = scalar_select %p2458_p7, 1, 0 }
  0x16   : > { %s2919_s29 = scalar_select %p2462_p8, 1, 0 }
  0x17   : > { %p2466_p9 = por %p185_p6, %p59_p2  ;;  %p192_p11 = scmp.lt.s32.totalorder %s2364_s23, 3 }
  0x18   : > { %2920 = sst [smem:[#allocation20_spill]] %s2919_s29  ;;  %s2366_s7 = smov [#allocation8]  }
  0x19   : > { %s2921_s30 = scalar_select %p2466_p9, 1, 0 }
  0x1a   : > { %p2472_p12 = pnand %p1641_p10, %p192_p11  ;;  %s204_s8 = sshll.u32 %s2366_s7, 4  ;;  %s2476_s8 = int_to_ptr.vmem [resolvable:$true] %s204_s8 }
  0x1b   : > { %2922 = sst [smem:[#allocation21_spill]] %s2921_s30  ;;  %s37_s10 = sadd.s32 1, %s2360_s22 }
  0x1c   : > { %s2923_s6 = scalar_select %p2472_p12, 1, 0 }
  0x1d   : > { %p2007_p13 = pneg %p2472_p12  ;;  %s2490_s11 = sand.u32 1, %s2352_s20  }
  0x1e   : > { %p2492_p4 = scmp.ge.s32.totalorder %s37_s10, 2  ;;  %s2926_s3 = sld [smem:[#allocation25_spill]] }
  0x1f   : > { %p2484_p2 = pnand %p2007_p13, %p2886_p3 }
  0x21   : > { %s2924_s9 = scalar_select %p2484_p2, 1, 0 }
  0x22   : > { %p2897_p10 = pneg %p2484_p2 }
  0x24   : > { %s2128_s15 = scalar_lea.hbm %s2926_s3, 4096 }
  0x25   : > { %p2129_p6 = scmp.ne.s32.totalorder %s2926_s3, %s2128_s15  ;;  %p2135_p0 = scmp.lt.u32.totalorder %s2128_s15, %s2926_s3 }
  0x27   : > { %p2131_p11 = pnand %p2897_p10, %p2129_p6 }
  0x29   : > { %p2132_p13 = pneg %p2131_p11 }
  0x2b   : > { %p2137_p3 = pnand %p2135_p0, %p2132_p13 }
  0x2d   : > { %2140 = shalt.err (!%p2137_p3)
}
  0x2e   : > { %s2141_s13 = scalar_lea.vmem %s2476_s8, 4096  ;;  %p2149_p7 = scmp.lt.s32.totalorder %s2476_s8, %s2476_s8 }
  0x2f   : > { %p2142_p1 = scmp.ne.s32.totalorder %s2476_s8, %s2141_s13  ;;  %p2150_p6 = scmp.lt.s32.totalorder %s2141_s13, %s2141_s13 }
  0x31   : > { %p2144_p9 = pnand %p2142_p1, %p2897_p10  ;;  %p2151_p11 = por %p2150_p6, %p2149_p7 }
  0x33   : > { %p2145_p8 = pneg %p2144_p9 }
  0x35   : > { %p2152_p12 = pnand %p2151_p11, %p2145_p8 }
  0x37   : > { %2155 = shalt.err (!%p2152_p12)
}
  0x38   : > { %s2893_s14 = smov 256   ;;  %s2368_s15 = smov 16  }
  0x39   : > { %2010 = dma.hbm_to_vmem [thread:$0]  (!%p2484_p2), %s2926_s3, 4096, %s2476_s8, [#allocation9], %s2893_s14, %s2893_s14, %s2368_s15  }
  0x3a   : > { %s2965_s10 = smov (%p2492_p4, %s37_s10), 0  ;;  %p2928_p3 = scmp.lt.s32.totalorder %s2364_s23, 2 }
  0x3b   : > { %2927 = sst [smem:[#allocation22_spill]] %s2965_s10  ;;  %s250_s7 = sand.u32 1, %s2364_s23  }
  0x3c   : > { %p2534_p7 = pnand %p2928_p3, %p2452_p5  ;;  %s41_s13 = ssub.s32 %s2360_s22, %s2965_s10 }
  0x3d   : > { %p44_p8 = scmp.eq.s32.totalorder %s41_s13, 0  ;;  %s2895_s26 = sshll.u32 %s2490_s11, 5 }
  0x3e   : > { %s2929_s25 = scalar_select %p2534_p7, 1, 0 }
  0x3f   : > { %s2896_s30 = sshll.u32 %s2360_s22, 9  ;;  %s2930_s18 = sadd.s32 1, %s2352_s20 }
  0x40   : > { %s2546_s5 = scalar_select %p44_p8, %s2352_s20, %s2930_s18  }
  0x41   : > { %s2932_s1 = sld [smem:[#allocation24_spill]]  ;;  %s254_s16 = scalar_lea.vmem [#allocation5], %s2895_s26 }
  0x42   : > { %2931 = sst [smem:[#allocation23_spill]] %s2546_s5  ;;  %s261_s17 = sshll.u32 %s254_s16, 4  ;;  %s2557_s17 = int_to_ptr.vmem [resolvable:$true] %s261_s17 }
  0x43   : > { %s2559_s13 = scalar_lea.sflag [#allocation6], %s250_s7  ;;  %p2565_p9 = pneg %p2534_p7 }
  0x45   : > { %s2933_s18 = scalar_select %p2565_p9, 1, 0 }
  0x47   : > { %s2553_s27 = scalar_lea.hbm %s2932_s1, %s2896_s30  ;;  %s2161_s26 = scalar_lea.hbm %s2932_s1, 1024 }
  0x48   : > { %s2156_s14 = scalar_lea.hbm %s2553_s27, 512  ;;  %p2162_p1 = scmp.lt.u32.totalorder %s2553_s27, %s2932_s1 }
  0x49   : > { %p2157_p5 = scmp.ne.s32.totalorder %s2553_s27, %s2156_s14  ;;  %p2163_p4 = scmp.lt.u32.totalorder %s2161_s26, %s2156_s14 }
  0x4a   : > { %p2165_p6 = scmp.lt.u32.totalorder %s2156_s14, %s2553_s27 }
  0x4b   : > { %p2159_p12 = pnand %p2565_p9, %p2157_p5  ;;  %p2164_p13 = por %p2163_p4, %p2162_p1 }
  0x4d   : > { %p2160_p0 = pneg %p2159_p12  ;;  %p2166_p11 = por %p2165_p6, %p2164_p13 }
  0x4f   : > { %p2167_p3 = pnand %p2166_p11, %p2160_p0 }
  0x51   : > { %2170 = shalt.err (!%p2167_p3)
}
  0x52   : > { %s2171_s7 = scalar_lea.vmem %s2557_s17, 512  ;;  %s2369_s8 = smov [#allocation5]  }
  0x53   : > { %p2172_p8 = scmp.ne.s32.totalorder %s2557_s17, %s2171_s7  ;;  %s2176_s12 = sshll.u32 %s2369_s8, 4  ;;  %s2177_s12 = int_to_ptr.vmem [resolvable:$false] %s2176_s12 }
  0x54   : > { %s2178_s30 = scalar_lea.vmem %s2177_s12, 1024  ;;  %p2179_p10 = scmp.lt.s32.totalorder %s2557_s17, %s2177_s12 }
  0x55   : > { %p2174_p5 = pnand %p2172_p8, %p2565_p9  ;;  %p2180_p2 = scmp.lt.s32.totalorder %s2178_s30, %s2171_s7 }
  0x57   : > { %p2175_p12 = pneg %p2174_p5  ;;  %p2181_p1 = por %p2180_p2, %p2179_p10 }
  0x59   : > { %p2182_p4 = pnand %p2181_p1, %p2175_p12 }
  0x5b   : > { %2185 = shalt.err (!%p2182_p4)
}
  0x5c   : > { %s2934_s26 = smov 256   ;;  %s2935_s14 = sshll.u32 %s2360_s22, 9 }
  0x5d   : > { %2020 = dma.hbm_to_vmem [thread:$0]  (!%p2534_p7), %s2553_s27, 512, %s2557_s17, %s2559_s13, %s2934_s26, %s2934_s26, %s2368_s15  }
  0x5e   : > { %s2597_s7 = scalar_lea.hbm %s2882_s2, %s2935_s14  ;;  %s2936_s12 = sshll.u32 %s2490_s11, 5 }
  0x5f   : > { %s275_s30 = scalar_lea.vmem [#allocation7], %s2936_s12  ;;  %s2370_s3 = smov [#allocation10]  }
  0x60   : > { %s282_s1 = sshll.u32 %s275_s30, 4  ;;  %s217_s10 = sshll.u32 %s2370_s3, 4  ;;  %s218_s10 = int_to_ptr.vmem [resolvable:$true] %s217_s10  ;;  %s2628_s1 = int_to_ptr.vmem [resolvable:$true] %s282_s1 }
  0x61   : > { %s2186_s23 = scalar_lea.hbm %s2884_s4, 4096  ;;  %p2937_p10 = scmp.ne.s32.totalorder %s2924_s9, 0 }
  0x62   : > { %p2187_p2 = scmp.ne.s32.totalorder %s2884_s4, %s2186_s23  ;;  %p2193_p11 = scmp.lt.u32.totalorder %s2186_s23, %s2884_s4 }
  0x63   : > { %p2938_p0 = pneg %p2937_p10 }
  0x65   : > { %p2189_p13 = pnand %p2187_p2, %p2938_p0 }
  0x67   : > { %p2190_p6 = pneg %p2189_p13 }
  0x69   : > { %p2195_p3 = pnand %p2193_p11, %p2190_p6 }
  0x6b   : > { %2198 = shalt.err (!%p2195_p3)
}
  0x6c   : > { %s2199_s3 = scalar_lea.vmem %s218_s10, 4096  ;;  %p2939_p5 = pmov %p2938_p0 }
  0x6d   : > { %p2200_p8 = scmp.ne.s32.totalorder %s218_s10, %s2199_s3  ;;  %p2207_p4 = scmp.lt.s32.totalorder %s218_s10, %s218_s10 }
  0x6e   : > { %p2208_p7 = scmp.lt.s32.totalorder %s2199_s3, %s2199_s3 }
  0x6f   : > { %p2202_p12 = pnand %p2200_p8, %p2939_p5 }
  0x70   : > { %p2209_p9 = por %p2208_p7, %p2207_p4 }
  0x71   : > { %p2203_p1 = pneg %p2202_p12 }
  0x73   : > { %p2210_p0 = pnand %p2209_p9, %p2203_p1 }
  0x75   : > { %2213 = shalt.err (!%p2210_p0)
}
  0x76   : > { %s2371_s5 = smov 128   ;;  %s2372_s20 = smov 8  }
  0x77   : > { %2013 = dma.hbm_to_vmem [thread:$0]  (!%p2937_p10), %s2884_s4, 4096, %s218_s10, [#allocation9], %s2371_s5, %s2371_s5, %s2372_s20  }
  0x78   : > { %s1645_s29 = sshll.u32 %s2490_s11, 3  ;;  %s1646_s14 = sshll.u32 %s2360_s22, 7 }
  0x79   : > { %s2626_s12 = scalar_lea.hbm %s2880_s0, %s1646_s14  ;;  %s235_s30 = scalar_lea.vmem [#allocation2], %s1645_s29 }
  0x7a   : > { %s243_s27 = sshll.u32 %s235_s30, 4  ;;  %s232_s9 = scalar_lea.sflag [#allocation3], %s2490_s11  ;;  %s244_s27 = int_to_ptr.vmem [resolvable:$true] %s243_s27 }
  0x7b   : > { %s2214_s17 = scalar_lea.hbm %s2626_s12, 128  ;;  %p2940_p9 = scmp.ne.s32.totalorder %s2933_s18, 0 }
  0x7c   : > { %p2215_p7 = scmp.ne.s32.totalorder %s2626_s12, %s2214_s17  ;;  %s2219_s5 = scalar_lea.hbm %s2880_s0, 256 }
  0x7d   : > { %p2220_p13 = scmp.lt.u32.totalorder %s2626_s12, %s2880_s0  ;;  %p2221_p6 = scmp.lt.u32.totalorder %s2219_s5, %s2214_s17 }
  0x7e   : > { %p2217_p2 = pnand %p2215_p7, %p2940_p9  ;;  %p2223_p3 = scmp.lt.u32.totalorder %s2214_s17, %s2626_s12 }
  0x7f   : > { %p2222_p11 = por %p2221_p6, %p2220_p13 }
  0x80   : > { %p2218_p10 = pneg %p2217_p2 }
  0x81   : > { %p2224_p8 = por %p2223_p3, %p2222_p11 }
  0x83   : > { %p2225_p5 = pnand %p2224_p8, %p2218_p10 }
  0x85   : > { %2228 = shalt.err (!%p2225_p5)
}
  0x86   : > { %s2229_s11 = scalar_lea.vmem %s244_s27, 128  ;;  %s2373_s23 = smov [#allocation2]  }
  0x87   : > { %p2230_p12 = scmp.ne.s32.totalorder %s244_s27, %s2229_s11  ;;  %s2234_s29 = sshll.u32 %s2373_s23, 4  ;;  %s2235_s29 = int_to_ptr.vmem [resolvable:$false] %s2234_s29 }
  0x88   : > { %s2236_s14 = scalar_lea.vmem %s2235_s29, 256  ;;  %p2237_p0 = scmp.lt.s32.totalorder %s244_s27, %s2235_s29 }
  0x89   : > { %p2232_p1 = pnand %p2230_p12, %p2940_p9  ;;  %p2238_p7 = scmp.lt.s32.totalorder %s2236_s14, %s2229_s11 }
  0x8b   : > { %p2233_p4 = pneg %p2232_p1  ;;  %p2239_p2 = por %p2238_p7, %p2237_p0 }
  0x8d   : > { %p2240_p6 = pnand %p2239_p2, %p2233_p4 }
  0x8f   : > { %2243 = shalt.err (!%p2240_p6)
}
  0x90   : > { %p2941_p13 = scmp.ne.s32.totalorder %s2929_s25, 0  ;;  %s2244_s16 = scalar_lea.hbm %s2597_s7, 512 }
  0x91   : > { %p2245_p10 = scmp.ne.s32.totalorder %s2597_s7, %s2244_s16  ;;  %s2249_s17 = scalar_lea.hbm %s2882_s2, 1024 }
  0x92   : > { %2017 = dma.hbm_to_vmem [thread:$0]  (!%p2941_p13), %s2626_s12, 128, %s244_s27, %s232_s9  }
  0x93   : > { %p2247_p11 = pnand %p2245_p10, %p2940_p9  ;;  %p2250_p8 = scmp.lt.u32.totalorder %s2597_s7, %s2882_s2 }
  0x94   : > { %p2251_p5 = scmp.lt.u32.totalorder %s2249_s17, %s2244_s16  ;;  %p2253_p1 = scmp.lt.u32.totalorder %s2244_s16, %s2597_s7 }
  0x95   : > { %p2248_p3 = pneg %p2247_p11 }
  0x96   : > { %p2252_p12 = por %p2251_p5, %p2250_p8 }
  0x98   : > { %p2254_p4 = por %p2253_p1, %p2252_p12 }
  0x9a   : > { %p2255_p0 = pnand %p2254_p4, %p2248_p3 }
  0x9c   : > { %2258 = shalt.err (!%p2255_p0)
}
  0x9d   : > { %s2259_s12 = scalar_lea.vmem %s2628_s1, 512  ;;  %s2374_s27 = smov [#allocation7]  }
  0x9e   : > { %p2260_p7 = scmp.ne.s32.totalorder %s2628_s1, %s2259_s12  ;;  %s2264_s9 = sshll.u32 %s2374_s27, 4  ;;  %s2265_s9 = int_to_ptr.vmem [resolvable:$false] %s2264_s9 }
  0x9f   : > { %s2266_s5 = scalar_lea.vmem %s2265_s9, 1024  ;;  %p2267_p10 = scmp.lt.s32.totalorder %s2628_s1, %s2265_s9 }
  0xa0   : > { %p2262_p2 = pnand %p2260_p7, %p2940_p9  ;;  %p2268_p11 = scmp.lt.s32.totalorder %s2266_s5, %s2259_s12 }
  0xa2   : > { %p2263_p6 = pneg %p2262_p2  ;;  %p2269_p8 = por %p2268_p11, %p2267_p10 }
  0xa4   : > { %p2270_p5 = pnand %p2269_p8, %p2263_p6 }
  0xa6   : > { %2273 = shalt.err (!%p2270_p5)
}
  0xa7   : > { %2023 = dma.hbm_to_vmem [thread:$0]  (!%p2941_p13), %s2597_s7, 512, %s2628_s1, %s2559_s13, %s2934_s26, %s2934_s26, %s2368_s15  }
  0xa8   : > { %p2942_p9 = scmp.ne.s32.totalorder %s2923_s6, 0 }
  0xa9   : > { %s2676_s18 = sand.u32 (!%p2942_p9), 1, %s2348_s19   ;;  %p2943_p3 = scmp.ne.s32.totalorder (!%p2942_p9), %s2918_s28, 0 }
  0xaa   : > { %294 = sbr.rel (%p2942_p9) target bundleno = 2591 (0xa1f), region = 40  ;;  %s1654_s20 = sshll.u32 (!%p2942_p9), %s2676_s18, 3 }
  0xab   : > { %s297_s21 = scalar_lea.sflag (!%p2942_p9), [#allocation3], %s2676_s18  ;;  %s2682_s25 = scalar_lea.vmem (!%p2942_p9), [#allocation2], %s1654_s20 }
  0xb1   : > { %2327 = dma.done.wait (%p2943_p3), %s297_s21, 128  }
  0xb2   : > { %2329 = vsyncadd (%p2943_p3), %s297_s21, 4294967168  ;;  %s305_s1 = sand.u32 1, %s2441_s24   ;;  %s1655_s6 = sshll.u32 %s2676_s18, 5 }
  0xb3   : > { %s306_s15 = scalar_lea.sflag [#allocation6], %s305_s1  ;;  %s2690_s13 = scalar_lea.vmem [#allocation5], %s1655_s6 }
  0xb4   : > { %2331 = dma.done.wait (%p2943_p3), %s306_s15, 1024  }
  0xb5   : > { %2333 = vsyncadd (%p2943_p3), %s306_s15, 4294966272  ;;  %s2696_s26 = scalar_lea.vmem [#allocation7], %s1655_s6  ;;  %p2944_p13 = scmp.eq.s32.totalorder %s2441_s24, 0 }
  0xb7   : > { %2335 = dma.done.wait (%p2944_p13), [#allocation9], 8192   ;;  %p2945_p12 = pmov %p2944_p13 }
  0xb8   : > { %v2375_v0 = vmov 0.0   ;;  %v2376_v1 = vmov 0.0|0.0   ;;  %v373_v2 = vld [vmem:[#allocation8 + $0x8] sm:$0xff]  ;;  %v375_v3 = vld [vmem:[#allocation8 + $0x18] sm:$0xff]  ;;  %v372_v4 = vld [vmem:[#allocation8] sm:$0xff]  ;;  %vm475_vm0 = vcmask 523264  }
  0xb9   : > { %2337 = vsyncadd (%p2945_p12), [#allocation9], 4294959104  ;;  %468 = vmatprep.mubr.f32.mxu0 %v2375_v0  ;;  %1910 = vmatprep.subr.bf16.mxu1 %v2376_v1  ;;  %v1878_v5 = vpack.c.bf16 %v375_v3, %v373_v2  ;;  %v374_v6 = vld [vmem:[#allocation8 + $0x10] sm:$0xff]  ;;  %v377_v7 = vld [vmem:[#allocation8 + $0x28] sm:$0xff]  ;;  %vm2377_vm2 = vmmov 0   ;;  %s2378_s24 = smov 64  }
  0xba   : > { %v379_v8 = vld [vmem:[#allocation8 + $0x38] sm:$0xff]  ;;  %v1880_v9 = vpack.c.bf16 %v374_v6, %v372_v4  ;;  %v376_v11 = vld [vmem:[#allocation8 + $0x20] sm:$0xff]  ;;  %v378_v12 = vld [vmem:[#allocation8 + $0x30] sm:$0xff]  ;;  %1750 = vmatprep.mubr.msk.f32.mxu1 %vm2377_vm2, %v2375_v0  ;;  %vm555_vm3 = vcmask 130048   ;;  %s2948_s28 = sld [smem:[#allocation18_spill]]  ;;  %s2949_s7 = sld [smem:[#allocation20_spill]] }
  0xbb   : > { %v1882_v10 = vpack.c.bf16 %v379_v8, %v377_v7  ;;  %v381_v13 = vld [vmem:[#allocation8 + $0x48] sm:$0xff]  ;;  %1879 = vmatprep.subr.bf16.mxu0 %v1878_v5  ;;  %v383_v14 = vld [vmem:[#allocation8 + $0x58] sm:$0xff]  ;;  %v1884_v15 = vpack.c.bf16 %v378_v12, %v376_v11  ;;  %v380_v17 = vld [vmem:[#allocation8 + $0x40] sm:$0xff]  ;;  %s362_s23 = scalar_lea.vmem [#allocation11], %s1654_s20  ;;  %s2950_s8 = sld [smem:[#allocation26_spill]] }
  0xbc   : > { %1881 = vmatpush1.bf16.msra.mxu0 %v1880_v9  ;;  %v1886_v16 = vpack.c.bf16 %v383_v14, %v381_v13  ;;  %v382_v18 = vld [vmem:[#allocation8 + $0x50] sm:$0xff]  ;;  %v385_v19 = vld [vmem:[#allocation8 + $0x68] sm:$0xff]  ;;  %v387_v20 = vld [vmem:[#allocation8 + $0x78] sm:$0xff]  ;;  %s1497_s29 = sshll.u32 %s362_s23, 4  ;;  %s1483_s17 = scalar_lea.sflag [#allocation4], %s2676_s18  ;;  %s2833_s29 = int_to_ptr.vmem [resolvable:$true] %s1497_s29 }
  0xbd   : > { %1883 = vmatprep.subr.bf16.mxu0 %v1882_v10  ;;  %v1888_v21 = vpack.c.bf16 %v382_v18, %v380_v17  ;;  %v1890_v22 = vpack.c.bf16 %v387_v20, %v385_v19  ;;  %v384_v23 = vld [vmem:[#allocation8 + $0x60] sm:$0xff]  ;;  %v386_v24 = vld [vmem:[#allocation8 + $0x70] sm:$0xff]  ;;  %v389_v25 = vld [vmem:[#allocation8 + $0x88] sm:$0xff]  ;;  %s2274_s10 = scalar_lea.vmem %s2833_s29, 128  ;;  %s2379_s3 = smov [#allocation11]  }
  0xbe   : > { %v391_v26 = vld [vmem:[#allocation8 + $0x98] sm:$0xff]  ;;  %v2705_v27 = vld [vmem:[%s2690_s13] sm:$0xff]  ;;  %v366_v28 = vld [vmem:[%s2690_s13 + $0x10] sm:$0xff]  ;;  %v1892_v30 = vpack.c.bf16 %v386_v24, %v384_v23  ;;  %p2275_p1 = scmp.ne.s32.totalorder %s2833_s29, %s2274_s10  ;;  %s2278_s12 = sshll.u32 %s2379_s3, 4  ;;  %s2279_s12 = int_to_ptr.vmem [resolvable:$false] %s2278_s12 }
  0xbf   : > { %vm2710_vm1 = vmpackc.low %vm475_vm0, %vm475_vm0  ;;  %v1911_v31 = vpack.c.bf16 %v366_v28, %v2705_v27  ;;  %v1894_v32 = vpack.c.bf16 %v391_v26, %v389_v25  ;;  %v388_v33 = vld [vmem:[#allocation8 + $0x80] sm:$0xff]  ;;  %v390_v34 = vld [vmem:[#allocation8 + $0x90] sm:$0xff]  ;;  %v2092_v62 = vpack.i.bf16 %v366_v28, %v2705_v27  ;;  %s2280_s27 = scalar_lea.vmem %s2279_s12, 256  ;;  %p2281_p2 = scmp.lt.s32.totalorder %s2833_s29, %s2279_s12 }
  0xc0   : > { %1885 = vmatpush1.bf16.msra.mxu0 %v1884_v15  ;;  %v393_v35 = vld [vmem:[#allocation8 + $0xa8] sm:$0xff]  ;;  %v395_v36 = vld [vmem:[#allocation8 + $0xb8] sm:$0xff]  ;;  %v1896_v37 = vpack.c.bf16 %v390_v34, %v388_v33  ;;  %v392_v39 = vld [vmem:[#allocation8 + $0xa0] sm:$0xff]  ;;  %s1681_s11 = sshll.u32 %s2948_s28, 7  ;;  %p2951_p4 = scmp.ne.s32.totalorder %s2949_s7, 0 }
  0xc1   : > { %1887 = vmatprep.subr.bf16.mxu0 %v1886_v16  ;;  %1913 = vmatpush3.bf16.xpose.msk.msra.mxu1 %vm2710_vm1, %v1911_v31  ;;  %v1898_v38 = vpack.c.bf16 %v395_v36, %v393_v35  ;;  %v394_v40 = vld [vmem:[#allocation8 + $0xb0] sm:$0xff]  ;;  %v397_v41 = vld [vmem:[#allocation8 + $0xc8] sm:$0xff]  ;;  %v399_v42 = vld [vmem:[#allocation8 + $0xd8] sm:$0xff]  ;;  %s2831_s30 = scalar_lea.hbm %s2950_s8, %s1681_s11  ;;  %p2282_p6 = scmp.lt.s32.totalorder %s2280_s27, %s2274_s10 }
  0xc2   : > { %1914 = vmatprep.subr.bf16.mxu1 %v2376_v1  ;;  %v1900_v43 = vpack.c.bf16 %v394_v40, %v392_v39  ;;  %v1902_v44 = vpack.c.bf16 %v399_v42, %v397_v41  ;;  %v396_v45 = vld [vmem:[#allocation8 + $0xc0] sm:$0xff]  ;;  %v398_v46 = vld [vmem:[#allocation8 + $0xd0] sm:$0xff]  ;;  %v401_v47 = vld [vmem:[#allocation8 + $0xe8] sm:$0xff]  ;;  %p2276_p0 = pnand %p2275_p1, %p2951_p4 }
  0xc3   : > { %v403_v48 = vld [vmem:[#allocation8 + $0xf8] sm:$0xff]  ;;  %v1904_v49 = vpack.c.bf16 %v398_v46, %v396_v45  ;;  %v400_v51 = vld [vmem:[#allocation8 + $0xe0] sm:$0xff]  ;;  %v402_v52 = vld [vmem:[#allocation8 + $0xf0] sm:$0xff]  ;;  %p2283_p10 = por %p2282_p6, %p2281_p2 }
  0xc4   : > { %1889 = vmatpush1.bf16.msra.mxu0 %v1888_v21  ;;  %v1906_v50 = vpack.c.bf16 %v403_v48, %v401_v47  ;;  %v1908_v53 = vpack.c.bf16 %v402_v52, %v400_v51  ;;  %v363_v54 = vld [vmem:[%s2682_s25] sm:$0xff]  ;;  %v368_v60 = vld [vmem:[%s2696_s26] sm:$0xff]  ;;  %v2751_v21 = vld [vmem:[%s2696_s26 + $0x8] sm:$0xff]  ;;  %p2277_p7 = pneg %p2276_p0 }
  0xc5   : > { %1891 = vmatprep.subr.bf16.mxu0 %v1890_v22  ;;  %v370_v61 = vld [vmem:[%s2696_s26 + $0x10] sm:$0xff]  ;;  %v2754_v22 = vld [vmem:[%s2696_s26 + $0x18] sm:$0xff]  ;;  %v825_v31 = vld [vmem:[#allocation10 + $0x48] sm:$0xff] }
  0xc6   : > { %v1915_v63 = vpack.c.bf16 %v370_v61, %v368_v60  ;;  %v2097_v11 = vpack.i.bf16 %v370_v61, %v368_v60  ;;  %v1953_v23 = vpack.c.bf16 %v2754_v22, %v2751_v21  ;;  %v2107_v33 = vpack.i.bf16 %v2754_v22, %v2751_v21  ;;  %v826_v34 = vld [vmem:[#allocation10 + $0x50] sm:$0xff]  ;;  %v827_v35 = vld [vmem:[#allocation10 + $0x58] sm:$0xff]  ;;  %v641_v36 = vld [vmem:[#allocation10] sm:$0xff]  ;;  %p2284_p11 = pnand %p2283_p10, %p2277_p7 }
  0xc7   : > { %v828_v41 = vld [vmem:[#allocation10 + $0x60] sm:$0xff]  ;;  %v829_v42 = vld [vmem:[#allocation10 + $0x68] sm:$0xff]  ;;  %v644_v45 = vld [vmem:[#allocation10 + $0x18] sm:$0xff] }
  0xc8   : > { %1893 = vmatpush1.bf16.msra.mxu0 %v1892_v30  ;;  %v824_v30 = vld [vmem:[#allocation10 + $0x40] sm:$0xff]  ;;  %v830_v47 = vld [vmem:[#allocation10 + $0x70] sm:$0xff]  ;;  %v831_v48 = vld [vmem:[#allocation10 + $0x78] sm:$0xff] }
  0xc9   : > { %1895 = vmatprep.subr.bf16.mxu0 %v1894_v32  ;;  %v1925_v32 = vpack.c.bf16 %v825_v31, %v824_v30  ;;  %v646_v51 = vld [vmem:[#allocation10 + $0x28] sm:$0xff]  ;;  %v1142_v30 = vld [vmem:[#allocation10 + $0x80] sm:$0xff] }
  0xca   : > { %v365_v61 = vld [vmem:[%s2690_s13 + $0x8] sm:$0xff] }
  0xcb   : > { %v1143_v31 = vld [vmem:[#allocation10 + $0x88] sm:$0xff] }
  0xcc   : > { %1897 = vmatpush1.bf16.msra.mxu0 %v1896_v37  ;;  %v1928_v37 = vpack.c.bf16 %v827_v35, %v826_v34  ;;  %v1145_v34 = vld [vmem:[#allocation10 + $0x98] sm:$0xff] }
  0xcd   : > { %1899 = vmatprep.subr.bf16.mxu0 %v1898_v38  ;;  %v642_v38 = vld [vmem:[#allocation10 + $0x8] sm:$0xff] }
  0xce   : > { %v1937_v39 = vpack.c.bf16 %v642_v38, %v641_v36  ;;  %v1146_v36 = vld [vmem:[#allocation10 + $0xa0] sm:$0xff] }
  0xd0   : > { %1901 = vmatpush1.bf16.msra.mxu0 %v1900_v43  ;;  %v1931_v43 = vpack.c.bf16 %v829_v42, %v828_v41 }
  0xd1   : > { %1903 = vmatprep.subr.bf16.mxu0 %v1902_v44  ;;  %v643_v44 = vld [vmem:[#allocation10 + $0x10] sm:$0xff] }
  0xd2   : > { %v1940_v46 = vpack.c.bf16 %v644_v45, %v643_v44 }
  0xd4   : > { %1905 = vmatpush1.bf16.msra.mxu0 %v1904_v49  ;;  %v1934_v49 = vpack.c.bf16 %v831_v48, %v830_v47 }
  0xd5   : > { %1907 = vmatprep.subr.bf16.mxu0 %v1906_v50  ;;  %v645_v50 = vld [vmem:[#allocation10 + $0x20] sm:$0xff] }
  0xd6   : > { %v1943_v52 = vpack.c.bf16 %v646_v51, %v645_v50  ;;  %v1399_v50 = vld [vmem:[#allocation10 + $0xc0] sm:$0xff]  ;;  %v1400_v51 = vld [vmem:[#allocation10 + $0xc8] sm:$0xff] }
  0xd8   : > { %1909 = vmatpush1.bf16.msra.mxu0 %v1908_v53  ;;  %v647_v53 = vld [vmem:[#allocation10 + $0x30] sm:$0xff] }
  0xd9   : > { %1924 = vmatprep.subr.bf16.mxu0 %v2376_v1 }
  0xdb   : > { %469 = vmatmul.mubr.f32.vlgmr.msra.gmra.mrb[0].mxu0 %v363_v54  ;;  %v648_v54 = vld [vmem:[#allocation10 + $0x38] sm:$0xff] }
  0xdc   : > { %1790 = vmatprep.mubr.msk.f32.mxu0 %vm2377_vm2, %v2375_v0  ;;  %1926 = vmatpush3.bf16.msra.mxu0 %v1925_v32  ;;  %v1956_v32 = vpack.c.bf16 %v1143_v31, %v1142_v30 }
  0xdd   : > { %1927 = vmatprep.subr.bf16.mxu0 %v2376_v1 }
  0xe0   : > { %1929 = vmatpush3.bf16.msra.mxu0 %v1928_v37  ;;  %v1147_v37 = vld [vmem:[#allocation10 + $0xa8] sm:$0xff] }
  0xe1   : > { %1930 = vmatprep.subr.bf16.mxu0 %v2376_v1  ;;  %v1962_v38 = vpack.c.bf16 %v1147_v37, %v1146_v36 }
  0xe4   : > { %1932 = vmatpush3.bf16.msra.mxu0 %v1931_v43 }
  0xe5   : > { %1933 = vmatprep.subr.bf16.mxu0 %v2376_v1 }
  0xe8   : > { %1935 = vmatpush3.bf16.msra.mxu0 %v1934_v49 }
  0xe9   : > { %1948 = vmatprep.subr.bf16.mxu0 %v2376_v1 }
 0x1ae   : > { %v470_v55 = vpop.f32.mrb[0].mxu0 }
 0x1af   : > { %649 = vrot.lane.b32.xlu1 %v470_v55, %s2378_s24  ;;  %v2725_v56 = vpop.f32.mrb[1].mxu0  ;;  %1751 = vmatmul.mubr.msk.f32.vlgmr.msra.gmra.mrb[0].mxu1 %vm475_vm0, %v470_v55  ;;  %v1946_v55 = vpack.c.bf16 %v648_v54, %v647_v53  ;;  %v1975_v53 = vpack.c.bf16 %v1400_v51, %v1399_v50  ;;  %v1402_v54 = vld [vmem:[#allocation10 + $0xd8] sm:$0xff] }
 0x1b0   : > { %1757 = vmatprep.mubr.msk.f32.mxu1 %vm2377_vm2, %v2375_v0  ;;  %1916 = vmatpush3.bf16.msra.mxu1 %v1915_v63 }
 0x1b1   : > { %1917 = vmatprep.subr.bf16.mxu1 %v2376_v1 }
 0x221   : > { %v650_v10 = vpop.permute.xlu1 %649 }
 0x282   : > { %v551_v57 = vpop.f32.mrb[0].mxu1 }
 0x283   : > { %v1752_v58 = vpop.f32.mrb[1].mxu1  ;;  %v556_v59 = vsel %vm555_vm3, %v551_v57, -inf }
 0x284   : > { %557 = vmax.xlane.f32.xlu0 %v556_v59 }
 0x29a   : > { %2093 = vrot.lane.b32.xlu0 %v2092_v62, %s2378_s24  ;;  %v367_v62 = vld [vmem:[%s2690_s13 + $0x18] sm:$0xff] }
 0x29e   : > { %2098 = vrot.lane.b32.xlu0 %v2097_v11, %s2378_s24 }
 0x311   : > { %v558_v2 = vpop.xlane.xlu0 %557 }
 0x312   : > { %v559_v3 = vsub.f32 %v551_v57, %v558_v2 }
 0x314   : > { %v560_v4 = vmul.f32 1.442695, %v559_v3 }
 0x315   : > { %v2094_v5 = vpop.permute.xlu0 %2093 }
 0x316   : > { %2112 = vpow2.f32 %v560_v4  ;;  %v2096_v6 = vunpack.i.h.bf16 %v2094_v5  ;;  %v2095_v7 = vunpack.i.l.bf16 %v2094_v5  ;;  %v1949_v5 = vpack.c.bf16 %v367_v62, %v365_v61 }
 0x318   : > { %v1918_v8 = vpack.c.bf16 %v2096_v6, %v2095_v7 }
 0x319   : > { %v2099_v17 = vpop.permute.xlu0 %2098 }
 0x31a   : > { %v2101_v18 = vunpack.i.h.bf16 %v2099_v17  ;;  %v2100_v19 = vunpack.i.l.bf16 %v2099_v17 }
 0x31c   : > { %v1922_v20 = vpack.c.bf16 %v2101_v18, %v2100_v19 }
 0x320   : > { %v2113_v9 = vpop.eup %2112 }
 0x321   : > { %1758 = vmatmul.mubr.msk.f32.vlgmr.msra.gmra.mrb[2].mxu1 %vm555_vm3, %v2113_v9  ;;  %v562_v40 = vsel %vm555_vm3, %v2113_v9, 0.0 }
 0x322   : > { %1920 = vmatpush3.bf16.xpose.msk.msra.mxu1 %vm2710_vm1, %v1918_v8  ;;  %1764 = vmatprep.mubr.msk.f32.mxu1 %vm2377_vm2, %v2375_v0 }
 0x323   : > { %1921 = vmatprep.subr.bf16.mxu1 %v2376_v1 }
 0x329   : > { %1765 = vmatmul.mubr.msk.f32.vlgmr.msra.gmra.mrb[4].mxu1 %vm475_vm0, %v650_v10 }
 0x32a   : > { %1771 = vmatprep.mubr.msk.f32.mxu1 %vm2377_vm2, %v2375_v0  ;;  %1923 = vmatpush3.bf16.msra.mxu1 %v1922_v20 }
 0x32b   : > { %1936 = vmatprep.subr.bf16.mxu1 %v2376_v1 }
 0x3f4   : > { %v2746_v12 = vpop.f32.mrb[2].mxu1 }
 0x3f5   : > { %v1759_v13 = vpop.f32.mrb[3].mxu1 }
 0x3f6   : > { %v2102_v13 = vpack.i.bf16 %v367_v62, %v365_v61 }
 0x3fc   : > { %v727_v14 = vpop.f32.mrb[4].mxu1 }
 0x3fd   : > { %v1766_v15 = vpop.f32.mrb[5].mxu1  ;;  %v731_v16 = vsel %vm555_vm3, %v727_v14, -inf }
 0x3fe   : > { %732 = vmax.xlane.f32.xlu1 %v731_v16 }
 0x48b   : > { %v733_v24 = vpop.xlane.xlu1 %732 }
 0x48c   : > { %v734_v25 = vsub.f32 %v727_v14, %v733_v24 }
 0x48e   : > { %v735_v26 = vmul.f32 1.442695, %v734_v25 }
 0x490   : > { %2114 = vpow2.f32 %v735_v26 }
 0x49a   : > { %v2115_v27 = vpop.eup %2114 }
 0x49b   : > { %1772 = vmatmul.mubr.msk.f32.vlgmr.msra.gmra.mrb[6].mxu1 %vm555_vm3, %v2115_v27  ;;  %v737_v28 = vsel %vm555_vm3, %v2115_v27, 0.0 }
 0x49c   : > { %738 = vadd.xlane.f32.xlu0 %v737_v28  ;;  %1809 = vmatprep.mubr.msk.f32.mxu1 %vm2377_vm2, %v2375_v0 }
 0x49d   : > { %1938 = vmatpush3.bf16.msra.mxu1 %v1937_v39  ;;  %v1148_v39 = vld [vmem:[#allocation10 + $0xb0] sm:$0xff] }
 0x49e   : > { %1939 = vmatprep.subr.bf16.mxu1 %v2376_v1 }
 0x4a1   : > { %1941 = vmatpush3.bf16.msra.mxu1 %v1940_v46 }
 0x4a2   : > { %1942 = vmatprep.subr.bf16.mxu1 %v2376_v1 }
 0x4a5   : > { %1944 = vmatpush3.bf16.msra.mxu1 %v1943_v52  ;;  %v1401_v52 = vld [vmem:[#allocation10 + $0xd0] sm:$0xff] }
 0x4a6   : > { %1945 = vmatprep.subr.bf16.mxu1 %v2376_v1 }
 0x4a9   : > { %1947 = vmatpush3.bf16.msra.mxu1 %v1946_v55  ;;  %v1978_v55 = vpack.c.bf16 %v1402_v54, %v1401_v52 }
 0x4aa   : > { %1955 = vmatprep.subr.bf16.mxu1 %v2376_v1 }
 0x4b2   : > { %1224 = vrot.lane.b32.xlu0 %v2725_v56, %s2378_s24 }
 0x4b6   : > { %2108 = vrot.lane.b32.xlu0 %v2107_v33, %s2378_s24  ;;  %v1144_v33 = vld [vmem:[#allocation10 + $0x90] sm:$0xff] }
 0x4b7   : > { %v1959_v35 = vpack.c.bf16 %v1145_v34, %v1144_v33 }
 0x4d5   : > { %563 = vadd.xlane.f32.xlu0 %v562_v40  ;;  %v1149_v40 = vld [vmem:[#allocation10 + $0xb8] sm:$0xff] }
 0x4d6   : > { %v1965_v41 = vpack.c.bf16 %v1149_v40, %v1148_v39 }
 0x529   : > { %v739_v57 = vpop.xlane.xlu0 %738 }
 0x52d   : > { %v1225_v58 = vpop.permute.xlu0 %1224 }
 0x531   : > { %v2109_v59 = vpop.permute.xlu0 %2108 }
 0x532   : > { %v2111_v21 = vunpack.i.h.bf16 %v2109_v59  ;;  %v2110_v22 = vunpack.i.l.bf16 %v2109_v59 }
 0x562   : > { %v564_v60 = vpop.xlane.xlu0 %563 }
 0x563   : > { %2116 = vrcp.f32 %v564_v60  ;;  %v1406_v60 = vld [vmem:[#allocation10 + $0xf8] sm:$0xff] }
 0x564   : > { %2118 = vrcp.f32 %v739_v57  ;;  %v1403_v57 = vld [vmem:[#allocation10 + $0xe0] sm:$0xff] }
 0x56d   : > { %v2117_v63 = vpop.eup %2116 }
 0x56e   : > { %v2119_v2 = vpop.eup %2118  ;;  %v640_v3 = vmul.f32 %v2117_v63, %v2746_v12  ;;  %v817_v4 = vpop.f32.mrb[6].mxu1 }
 0x56f   : > { %v823_v6 = vmul.f32 %v2119_v2, %v817_v4  ;;  %v1773_v7 = vpop.f32.mrb[7].mxu1 }
 0x570   : > { %1810 = vmatmul.mubr.msk.f32.vlgmr.msra.gmra.mrb[8].mxu1 %vm475_vm0, %v640_v3 }
 0x571   : > { %1791 = vmatmul.mubr.msk.f32.vlgmr.msra.gmra.mrb[2].mxu0 %vm475_vm0, %v823_v6  ;;  %1842 = vmatprep.mubr.msk.f32.mxu1 %vm2377_vm2, %v2375_v0 }
 0x572   : > { %1951 = vmatpush3.bf16.xpose.msk.msra.mxu0 %vm2710_vm1, %v1949_v5  ;;  %1816 = vmatprep.mubr.msk.f32.mxu0 %vm2377_vm2, %v2375_v0 }
 0x573   : > { %1952 = vmatprep.subr.bf16.mxu0 %v2376_v1  ;;  %1957 = vmatpush3.bf16.msra.mxu1 %v1956_v32 }
 0x574   : > { %1958 = vmatprep.subr.bf16.mxu1 %v2376_v1 }
 0x577   : > { %1960 = vmatpush3.bf16.msra.mxu1 %v1959_v35 }
 0x578   : > { %1961 = vmatprep.subr.bf16.mxu1 %v2376_v1 }
 0x579   : > { %1817 = vmatmul.mubr.msk.f32.vlgmr.msra.gmra.mrb[4].mxu0 %vm475_vm0, %v2725_v56 }
 0x57a   : > { %1954 = vmatpush3.bf16.msra.mxu0 %v1953_v23  ;;  %1823 = vmatprep.mubr.msk.f32.mxu0 %vm2377_vm2, %v2375_v0  ;;  %v1972_v23 = vpack.c.bf16 %v2111_v21, %v2110_v22 }
 0x57b   : > { %1967 = vmatprep.subr.bf16.mxu0 %v2376_v1  ;;  %1963 = vmatpush3.bf16.msra.mxu1 %v1962_v38 }
 0x57c   : > { %1964 = vmatprep.subr.bf16.mxu1 %v2376_v1 }
 0x57f   : > { %1966 = vmatpush3.bf16.msra.mxu1 %v1965_v41 }
 0x580   : > { %1974 = vmatprep.subr.bf16.mxu1 %v2376_v1 }
 0x644   : > { %v2796_v8 = vpop.f32.mrb[2].mxu0 }
 0x645   : > { %v1792_v9 = vpop.f32.mrb[3].mxu0 }
 0x64c   : > { %v1053_v10 = vpop.f32.mrb[4].mxu0 }
 0x64d   : > { %v1818_v11 = vpop.f32.mrb[5].mxu0  ;;  %v1057_v12 = vsel %vm555_vm3, %v1053_v10, -inf }
 0x64e   : > { %1058 = vmax.xlane.f32.xlu1 %v1057_v12 }
 0x65f   : > { %2103 = vrot.lane.b32.xlu1 %v2102_v13, %s2378_s24 }
 0x6db   : > { %v1059_v56 = vpop.xlane.xlu1 %1058 }
 0x6dc   : > { %v1060_v14 = vsub.f32 %v1053_v10, %v1059_v56 }
 0x6de   : > { %v1061_v15 = vmul.f32 1.442695, %v1060_v14 }
 0x6df   : > { %v2104_v16 = vpop.permute.xlu1 %2103 }
 0x6e0   : > { %2120 = vpow2.f32 %v1061_v15  ;;  %v2106_v17 = vunpack.i.h.bf16 %v2104_v16  ;;  %v2105_v18 = vunpack.i.l.bf16 %v2104_v16 }
 0x6e2   : > { %v1968_v19 = vpack.c.bf16 %v2106_v17, %v2105_v18 }
 0x6ea   : > { %v2121_v20 = vpop.eup %2120 }
 0x6eb   : > { %1824 = vmatmul.mubr.msk.f32.vlgmr.msra.gmra.mrb[6].mxu0 %vm555_vm3, %v2121_v20  ;;  %v1063_v29 = vsel %vm555_vm3, %v2121_v20, 0.0 }
 0x6ec   : > { %1970 = vmatpush3.bf16.xpose.msk.msra.mxu0 %vm2710_vm1, %v1968_v19  ;;  %1849 = vmatprep.mubr.msk.f32.mxu0 %vm2377_vm2, %v2375_v0 }
 0x6ed   : > { %1971 = vmatprep.subr.bf16.mxu0 %v2376_v1 }
 0x6f3   : > { %1850 = vmatmul.mubr.msk.f32.vlgmr.msra.gmra.mrb[8].mxu0 %vm475_vm0, %v1225_v58  ;;  %v1404_v58 = vld [vmem:[#allocation10 + $0xe8] sm:$0xff] }
 0x6f4   : > { %1973 = vmatpush3.bf16.msra.mxu0 %v1972_v23  ;;  %1856 = vmatprep.mubr.msk.f32.mxu0 %vm2377_vm2, %v2375_v0  ;;  %v1981_v59 = vpack.c.bf16 %v1404_v58, %v1403_v57 }
 0x7be   : > { %v1135_v24 = vpop.f32.mrb[6].mxu0 }
 0x7bf   : > { %v1825_v25 = vpop.f32.mrb[7].mxu0 }
 0x7c6   : > { %v1302_v26 = vpop.f32.mrb[8].mxu0 }
 0x7c7   : > { %v1851_v27 = vpop.f32.mrb[9].mxu0  ;;  %v1306_v28 = vsel %vm555_vm3, %v1302_v26, -inf }
 0x7c8   : > { %1307 = vmax.xlane.f32.xlu1 %v1306_v28 }
 0x7cc   : > { %1064 = vadd.xlane.f32.xlu1 %v1063_v29 }
 0x855   : > { %v1308_v42 = vpop.xlane.xlu1 %1307 }
 0x856   : > { %v1309_v43 = vsub.f32 %v1302_v26, %v1308_v42 }
 0x858   : > { %v1310_v44 = vmul.f32 1.442695, %v1309_v43 }
 0x859   : > { %v1065_v45 = vpop.xlane.xlu1 %1064 }
 0x85a   : > { %2122 = vpow2.f32 %v1310_v44 }
 0x85b   : > { %2124 = vrcp.f32 %v1065_v45 }
 0x864   : > { %v2123_v46 = vpop.eup %2122 }
 0x865   : > { %v2125_v47 = vpop.eup %2124  ;;  %1857 = vmatmul.mubr.msk.f32.vlgmr.msra.gmra.mrb[10].mxu0 %vm555_vm3, %v2123_v46  ;;  %v1312_v48 = vsel %vm555_vm3, %v2123_v46, 0.0 }
 0x866   : > { %v1141_v49 = vmul.f32 %v2125_v47, %v1135_v24  ;;  %1313 = vadd.xlane.f32.xlu1 %v1312_v48 }
 0x868   : > { %1843 = vmatmul.mubr.msk.f32.vlgmr.msra.gmra.mrb[8].mxu1 %vm475_vm0, %v1141_v49 }
 0x869   : > { %1875 = vmatprep.mubr.msk.f32.mxu1 %vm2377_vm2, %v2375_v0  ;;  %1976 = vmatpush3.bf16.msra.mxu1 %v1975_v53  ;;  %v1405_v0 = vld [vmem:[#allocation10 + $0xf0] sm:$0xff] }
 0x86a   : > { %1977 = vmatprep.subr.bf16.mxu1 %v2376_v1  ;;  %v1984_v61 = vpack.c.bf16 %v1406_v60, %v1405_v0 }
 0x86d   : > { %1979 = vmatpush3.bf16.msra.mxu1 %v1978_v55 }
 0x86e   : > { %1980 = vmatprep.subr.bf16.mxu1 %v2376_v1 }
 0x871   : > { %1982 = vmatpush3.bf16.msra.mxu1 %v1981_v59 }
 0x872   : > { %1983 = vmatprep.subr.bf16.mxu1 %v2376_v1 }
 0x875   : > { %1985 = vmatpush3.bf16.msra.mxu1 %v1984_v61 }
 0x8f3   : > { %v1314_v62 = vpop.xlane.xlu1 %1313 }
 0x8f4   : > { %2126 = vrcp.f32 %v1314_v62 }
 0x8fe   : > { %v2127_v63 = vpop.eup %2126 }
 0x938   : > { %v1392_v2 = vpop.f32.mrb[10].mxu0 }
 0x939   : > { %v1398_v3 = vmul.f32 %v2127_v63, %v1392_v2  ;;  %v1858_v4 = vpop.f32.mrb[11].mxu0 }
 0x93b   : > { %1876 = vmatmul.mubr.msk.f32.vlgmr.msra.gmra.mrb[8].mxu1 %vm475_vm0, %v1398_v3 }
 0xa0e   : > { %v1476_v5 = vpop.f32.mrb[8].mxu1 }
 0xa0f   : > { %v1986_v1 = vadd.f32 %v1476_v5, %v2796_v8  ;;  %v1877_v6 = vpop.f32.mrb[9].mxu1 }
 0xa11   : > { %1481 = vst [vmem:[%s362_s23] sm:$0xff] %v1986_v1 }
 0xa12   : > { %2287 = shalt.err (!%p2284_p11)
}
 0xa13   : > { %s2288_s9 = scalar_lea.hbm %s2831_s30, 128  ;;  %s2292_s20 = scalar_lea.hbm %s2950_s8, 256 }
 0xa14   : > { %p2289_p8 = scmp.ne.s32.totalorder %s2831_s30, %s2288_s9  ;;  %p2293_p3 = scmp.lt.u32.totalorder %s2831_s30, %s2950_s8 }
 0xa15   : > { %p2294_p13 = scmp.lt.u32.totalorder %s2292_s20, %s2288_s9  ;;  %p2296_p1 = scmp.lt.u32.totalorder %s2288_s9, %s2831_s30 }
 0xa16   : > { %p2290_p5 = pnand %p2289_p8, %p2951_p4 }
 0xa17   : > { %p2295_p12 = por %p2294_p13, %p2293_p3 }
 0xa18   : > { %p2291_p9 = pneg %p2290_p5 }
 0xa19   : > { %p2297_p0 = por %p2296_p1, %p2295_p12 }
 0xa1b   : > { %p2298_p7 = pnand %p2297_p0, %p2291_p9 }
 0xa1d   : > { %2301 = shalt.err (!%p2298_p7)
}
 0xa1e   : > { %2005 = dma.vmem_to_hbm [thread:$0]  (%p2951_p4), %s2833_s29, 128, %s2831_s30, %s1483_s17  }
 0xa1f PF: > { %s2952_s1 = sld [smem:[#allocation16_spill]]  ;;  %s2953_s6 = sld [smem:[#allocation21_spill]] }
 0xa20   : > { %s2954_s15 = sld [smem:[#allocation19_spill]] }
 0xa25   : > { %s1509_s13 = sand.u32 1, %s2952_s1   ;;  %p2955_p2 = scmp.ne.s32.totalorder %s2953_s6, 0 }
 0xa26   : > { %p2956_p6 = scmp.ge.s32.totalorder %s2954_s15, 2  ;;  %s1510_s26 = scalar_lea.sflag [#allocation4], %s1509_s13 }
 0xa28   : > { %p2025_p10 = pnand %p2956_p6, %p2955_p2 }
 0xa2a   : > { %2339 = dma.done.wait (!%p2025_p10), %s1510_s26, 128  }
 0xa2b   : > { %2341 = vsyncadd (!%p2025_p10), %s1510_s26, 4294967168  ;;  %s25_s23 = sadd.s32 1, %s2954_s15   ;;  %s2957_s24 = sld [smem:[#allocation17_spill]] }
 0xa2c   : > { %p22_p11 = scmp.ge.s32.totalorder %s25_s23, 4   ;;  %s2958_s20 = sld [smem:[#allocation23_spill]] }
 0xa2d   : > { %s2959_s28 = sld [smem:[#allocation22_spill]]  ;;  %s2960_s18 = smov %s2348_s19 }
 0xa2e   : > { %s2962_s21 = smov %s2360_s22  ;;  %24 = sbr.rel (!%p22_p11) target bundleno = 13 (0xd), region = 117 }
 0xa31   : > { %s2961_s19 = smov %s2957_s24 }
 0xa33   : > { %s2963_s22 = smov %s2959_s28 }
 0xa35   :  { %1515 = vsyncpa [#allocation3], 1 }
 0xa36   :  { %1517 = vsyncpa [#allocation3 + $0x1], 1 }
 0xa37   :  { %1518 = vsyncpa [#allocation6], 1 }
 0xa38   :  { %1520 = vsyncpa [#allocation6 + $0x1], 1 }
 0xa39   :  { %1521 = vsyncpa [#allocation9], 1 }
 0xa3a   :  { %1522 = vsyncpa [#allocation4], 1 }
 0xa3b   :  { %1524 = vsyncpa [#allocation4 + $0x1], 1 }

// kernel: tpu_custom_call.1
= control target key start
LH: loop header
LB: loop body
LE: loop exit
PB: predicated region body
PF: predicated region fallthrough
CT: control target
= control target key end

     0   :  { %s2880_s0 = inlined_call_operand.hbm [shape: f32[2,8,128], index: 0, kind: input, shape index: {}]   ;;  %s2881_s1 = inlined_call_operand.hbm [shape: f32[2,16,256], index: 1, kind: input, shape index: {}]   ;;  %s2882_s2 = inlined_call_operand.hbm [shape: f32[2,16,256], index: 2, kind: input, shape index: {}]   ;;  %s2883_s3 = inlined_call_operand.hbm [shape: f32[128,256], index: 3, kind: input, shape index: {}]   ;;  %s2884_s4 = inlined_call_operand.hbm [shape: f32[256,128], index: 4, kind: input, shape index: {}]   ;;  %s2885_s5 = inlined_call_operand.hbm [shape: f32[2,8,128], index: 5, kind: output, shape index: {}]  }
   0x1   :  { %2910 = sst [smem:[#allocation24_spill]] %s2881_s1 }
   0x2   :  { %2911 = sst [smem:[#allocation25_spill]] %s2883_s3 }
   0x3   :  { %2912 = sst [smem:[#allocation26_spill]] %s2885_s5 }
   0x4   :  { %10 = vsyncpa [#allocation3], 0 }
   0x5   :  { %12 = vsyncpa [#allocation3 + $0x1], 0 }
   0x6   :  { %13 = vsyncpa [#allocation6], 0 }
   0x7   :  { %15 = vsyncpa [#allocation6 + $0x1], 0 }
   0x8   :  { %16 = vsyncpa [#allocation9], 0 }
   0x9   :  { %17 = vsyncpa [#allocation4], 0 }
   0xa   :  { %19 = vsyncpa [#allocation4 + $0x1], 0  ;;  %s2410_s18 = smov 0   ;;  %s2412_s19 = smov 0  }
   0xb   :  { %s2414_s20 = smov 0   ;;  %s2416_s21 = smov 0  }
   0xc   :  { %s2418_s22 = smov 0   ;;  %s2420_s23 = smov 0  }
   0xd LB: > { %2913 = sst [smem:[#allocation16_spill]] %s2344_s18  ;;  %s2441_s24 = sadd.s32 4294967295, %s2364_s23   ;;  %s2364_s23 = sphi %s2420_s23, %s25_s23   ;;  %s2360_s22 = sphi %s2418_s22, %s2963_s22   ;;  %s2356_s21 = sphi %s2416_s21, %s2962_s21   ;;  %s2352_s20 = sphi %s2414_s20, %s2958_s20   ;;  %s2348_s19 = sphi %s2412_s19, %s2961_s19   ;;  %s2344_s18 = sphi %s2410_s18, %s2960_s18  }
   0xe   : > { %2914 = sst [smem:[#allocation17_spill]] %s2352_s20  ;;  %s1640_s25 = sadd.s32 4294967294, %s2364_s23  }
   0xf   : > { %2915 = sst [smem:[#allocation18_spill]] %s2356_s21  ;;  %p53_p0 = scmp.ne.s32.totalorder %s2352_s20, %s2348_s19 }
  0x10   : > { %2916 = sst [smem:[#allocation19_spill]] %s2364_s23  ;;  %p54_p1 = scmp.eq.s32.totalorder %s2364_s23, 0 }
  0x11   : > { %p59_p2 = scmp.ne.s32.totalorder %s2348_s19, %s2344_s18  ;;  %p2886_p3 = scmp.eq.s32.totalorder %s2441_s24, 0 }
  0x12   : > { %p179_p4 = scmp.eq.s32.totalorder %s2441_s24, 1  ;;  %p2452_p5 = por %p54_p1, %p53_p0 }
  0x13   : > { %p185_p6 = scmp.eq.s32.totalorder %s1640_s25, 1  ;;  %p2458_p7 = por %p2886_p3, %p59_p2 }
  0x14   : > { %p2462_p8 = por %p179_p4, %p53_p0  ;;  %p1641_p10 = scmp.ge.s32.totalorder %s2364_s23, 1 }
  0x15   : > { %s2918_s28 = scalar_select %p2458_p7, 1, 0 }
  0x16   : > { %s2919_s29 = scalar_select %p2462_p8, 1, 0 }
  0x17   : > { %p2466_p9 = por %p185_p6, %p59_p2  ;;  %p192_p11 = scmp.lt.s32.totalorder %s2364_s23, 3 }
  0x18   : > { %2920 = sst [smem:[#allocation20_spill]] %s2919_s29  ;;  %s2366_s7 = smov [#allocation8]  }
  0x19   : > { %s2921_s30 = scalar_select %p2466_p9, 1, 0 }
  0x1a   : > { %p2472_p12 = pnand %p1641_p10, %p192_p11  ;;  %s204_s8 = sshll.u32 %s2366_s7, 4  ;;  %s2476_s8 = int_to_ptr.vmem [resolvable:$true] %s204_s8 }
  0x1b   : > { %2922 = sst [smem:[#allocation21_spill]] %s2921_s30  ;;  %s37_s10 = sadd.s32 1, %s2360_s22 }
  0x1c   : > { %s2923_s6 = scalar_select %p2472_p12, 1, 0 }
  0x1d   : > { %p2007_p13 = pneg %p2472_p12  ;;  %s2490_s11 = sand.u32 1, %s2352_s20  }
  0x1e   : > { %p2492_p4 = scmp.ge.s32.totalorder %s37_s10, 2  ;;  %s2926_s3 = sld [smem:[#allocation25_spill]] }
  0x1f   : > { %p2484_p2 = pnand %p2007_p13, %p2886_p3 }
  0x21   : > { %s2924_s9 = scalar_select %p2484_p2, 1, 0 }
  0x22   : > { %p2897_p10 = pneg %p2484_p2 }
  0x24   : > { %s2128_s15 = scalar_lea.hbm %s2926_s3, 4096 }
  0x25   : > { %p2129_p6 = scmp.ne.s32.totalorder %s2926_s3, %s2128_s15  ;;  %p2135_p0 = scmp.lt.u32.totalorder %s2128_s15, %s2926_s3 }
  0x27   : > { %p2131_p11 = pnand %p2897_p10, %p2129_p6 }
  0x29   : > { %p2132_p13 = pneg %p2131_p11 }
  0x2b   : > { %p2137_p3 = pnand %p2135_p0, %p2132_p13 }
  0x2d   : > { %2140 = shalt.err (!%p2137_p3)
}
  0x2e   : > { %s2141_s13 = scalar_lea.vmem %s2476_s8, 4096  ;;  %p2149_p7 = scmp.lt.s32.totalorder %s2476_s8, %s2476_s8 }
  0x2f   : > { %p2142_p1 = scmp.ne.s32.totalorder %s2476_s8, %s2141_s13  ;;  %p2150_p6 = scmp.lt.s32.totalorder %s2141_s13, %s2141_s13 }
  0x31   : > { %p2144_p9 = pnand %p2142_p1, %p2897_p10  ;;  %p2151_p11 = por %p2150_p6, %p2149_p7 }
  0x33   : > { %p2145_p8 = pneg %p2144_p9 }
  0x35   : > { %p2152_p12 = pnand %p2151_p11, %p2145_p8 }
  0x37   : > { %2155 = shalt.err (!%p2152_p12)
}
  0x38   : > { %s2893_s14 = smov 256   ;;  %s2368_s15 = smov 16  }
  0x39   : > { %2010 = dma.hbm_to_vmem [thread:$0]  (!%p2484_p2), %s2926_s3, 4096, %s2476_s8, [#allocation9], %s2893_s14, %s2893_s14, %s2368_s15  }
  0x3a   : > { %s2965_s10 = smov (%p2492_p4, %s37_s10), 0  ;;  %p2928_p3 = scmp.lt.s32.totalorder %s2364_s23, 2 }
  0x3b   : > { %2927 = sst [smem:[#allocation22_spill]] %s2965_s10  ;;  %s250_s7 = sand.u32 1, %s2364_s23  }
  0x3c   : > { %p2534_p7 = pnand %p2928_p3, %p2452_p5  ;;  %s41_s13 = ssub.s32 %s2360_s22, %s2965_s10 }
  0x3d   : > { %p44_p8 = scmp.eq.s32.totalorder %s41_s13, 0  ;;  %s2895_s26 = sshll.u32 %s2490_s11, 5 }
  0x3e   : > { %s2929_s25 = scalar_select %p2534_p7, 1, 0 }
  0x3f   : > { %s2896_s30 = sshll.u32 %s2360_s22, 9  ;;  %s2930_s18 = sadd.s32 1, %s2352_s20 }
  0x40   : > { %s2546_s5 = scalar_select %p44_p8, %s2352_s20, %s2930_s18  }
  0x41   : > { %s2932_s1 = sld [smem:[#allocation24_spill]]  ;;  %s254_s16 = scalar_lea.vmem [#allocation5], %s2895_s26 }
  0x42   : > { %2931 = sst [smem:[#allocation23_spill]] %s2546_s5  ;;  %s261_s17 = sshll.u32 %s254_s16, 4  ;;  %s2557_s17 = int_to_ptr.vmem [resolvable:$true] %s261_s17 }
  0x43   : > { %s2559_s13 = scalar_lea.sflag [#allocation6], %s250_s7  ;;  %p2565_p9 = pneg %p2534_p7 }
  0x45   : > { %s2933_s18 = scalar_select %p2565_p9, 1, 0 }
  0x47   : > { %s2553_s27 = scalar_lea.hbm %s2932_s1, %s2896_s30  ;;  %s2161_s26 = scalar_lea.hbm %s2932_s1, 1024 }
  0x48   : > { %s2156_s14 = scalar_lea.hbm %s2553_s27, 512  ;;  %p2162_p1 = scmp.lt.u32.totalorder %s2553_s27, %s2932_s1 }
  0x49   : > { %p2157_p5 = scmp.ne.s32.totalorder %s2553_s27, %s2156_s14  ;;  %p2163_p4 = scmp.lt.u32.totalorder %s2161_s26, %s2156_s14 }
  0x4a   : > { %p2165_p6 = scmp.lt.u32.totalorder %s2156_s14, %s2553_s27 }
  0x4b   : > { %p2159_p12 = pnand %p2565_p9, %p2157_p5  ;;  %p2164_p13 = por %p2163_p4, %p2162_p1 }
  0x4d   : > { %p2160_p0 = pneg %p2159_p12  ;;  %p2166_p11 = por %p2165_p6, %p2164_p13 }
  0x4f   : > { %p2167_p3 = pnand %p2166_p11, %p2160_p0 }
  0x51   : > { %2170 = shalt.err (!%p2167_p3)
}
  0x52   : > { %s2171_s7 = scalar_lea.vmem %s2557_s17, 512  ;;  %s2369_s8 = smov [#allocation5]  }
  0x53   : > { %p2172_p8 = scmp.ne.s32.totalorder %s2557_s17, %s2171_s7  ;;  %s2176_s12 = sshll.u32 %s2369_s8, 4  ;;  %s2177_s12 = int_to_ptr.vmem [resolvable:$false] %s2176_s12 }
  0x54   : > { %s2178_s30 = scalar_lea.vmem %s2177_s12, 1024  ;;  %p2179_p10 = scmp.lt.s32.totalorder %s2557_s17, %s2177_s12 }
  0x55   : > { %p2174_p5 = pnand %p2172_p8, %p2565_p9  ;;  %p2180_p2 = scmp.lt.s32.totalorder %s2178_s30, %s2171_s7 }
  0x57   : > { %p2175_p12 = pneg %p2174_p5  ;;  %p2181_p1 = por %p2180_p2, %p2179_p10 }
  0x59   : > { %p2182_p4 = pnand %p2181_p1, %p2175_p12 }
  0x5b   : > { %2185 = shalt.err (!%p2182_p4)
}
  0x5c   : > { %s2934_s26 = smov 256   ;;  %s2935_s14 = sshll.u32 %s2360_s22, 9 }
  0x5d   : > { %2020 = dma.hbm_to_vmem [thread:$0]  (!%p2534_p7), %s2553_s27, 512, %s2557_s17, %s2559_s13, %s2934_s26, %s2934_s26, %s2368_s15  }
  0x5e   : > { %s2597_s7 = scalar_lea.hbm %s2882_s2, %s2935_s14  ;;  %s2936_s12 = sshll.u32 %s2490_s11, 5 }
  0x5f   : > { %s275_s30 = scalar_lea.vmem [#allocation7], %s2936_s12  ;;  %s2370_s3 = smov [#allocation10]  }
  0x60   : > { %s282_s1 = sshll.u32 %s275_s30, 4  ;;  %s217_s10 = sshll.u32 %s2370_s3, 4  ;;  %s218_s10 = int_to_ptr.vmem [resolvable:$true] %s217_s10  ;;  %s2628_s1 = int_to_ptr.vmem [resolvable:$true] %s282_s1 }
  0x61   : > { %s2186_s23 = scalar_lea.hbm %s2884_s4, 4096  ;;  %p2937_p10 = scmp.ne.s32.totalorder %s2924_s9, 0 }
  0x62   : > { %p2187_p2 = scmp.ne.s32.totalorder %s2884_s4, %s2186_s23  ;;  %p2193_p11 = scmp.lt.u32.totalorder %s2186_s23, %s2884_s4 }
  0x63   : > { %p2938_p0 = pneg %p2937_p10 }
  0x65   : > { %p2189_p13 = pnand %p2187_p2, %p2938_p0 }
  0x67   : > { %p2190_p6 = pneg %p2189_p13 }
  0x69   : > { %p2195_p3 = pnand %p2193_p11, %p2190_p6 }
  0x6b   : > { %2198 = shalt.err (!%p2195_p3)
}
  0x6c   : > { %s2199_s3 = scalar_lea.vmem %s218_s10, 4096  ;;  %p2939_p5 = pmov %p2938_p0 }
  0x6d   : > { %p2200_p8 = scmp.ne.s32.totalorder %s218_s10, %s2199_s3  ;;  %p2207_p4 = scmp.lt.s32.totalorder %s218_s10, %s218_s10 }
  0x6e   : > { %p2208_p7 = scmp.lt.s32.totalorder %s2199_s3, %s2199_s3 }
  0x6f   : > { %p2202_p12 = pnand %p2200_p8, %p2939_p5 }
  0x70   : > { %p2209_p9 = por %p2208_p7, %p2207_p4 }
  0x71   : > { %p2203_p1 = pneg %p2202_p12 }
  0x73   : > { %p2210_p0 = pnand %p2209_p9, %p2203_p1 }
  0x75   : > { %2213 = shalt.err (!%p2210_p0)
}
  0x76   : > { %s2371_s5 = smov 128   ;;  %s2372_s20 = smov 8  }
  0x77   : > { %2013 = dma.hbm_to_vmem [thread:$0]  (!%p2937_p10), %s2884_s4, 4096, %s218_s10, [#allocation9], %s2371_s5, %s2371_s5, %s2372_s20  }
  0x78   : > { %s1645_s29 = sshll.u32 %s2490_s11, 3  ;;  %s1646_s14 = sshll.u32 %s2360_s22, 7 }
  0x79   : > { %s2626_s12 = scalar_lea.hbm %s2880_s0, %s1646_s14  ;;  %s235_s30 = scalar_lea.vmem [#allocation2], %s1645_s29 }
  0x7a   : > { %s243_s27 = sshll.u32 %s235_s30, 4  ;;  %s232_s9 = scalar_lea.sflag [#allocation3], %s2490_s11  ;;  %s244_s27 = int_to_ptr.vmem [resolvable:$true] %s243_s27 }
  0x7b   : > { %s2214_s17 = scalar_lea.hbm %s2626_s12, 128  ;;  %p2940_p9 = scmp.ne.s32.totalorder %s2933_s18, 0 }
  0x7c   : > { %p2215_p7 = scmp.ne.s32.totalorder %s2626_s12, %s2214_s17  ;;  %s2219_s5 = scalar_lea.hbm %s2880_s0, 256 }
  0x7d   : > { %p2220_p13 = scmp.lt.u32.totalorder %s2626_s12, %s2880_s0  ;;  %p2221_p6 = scmp.lt.u32.totalorder %s2219_s5, %s2214_s17 }
  0x7e   : > { %p2217_p2 = pnand %p2215_p7, %p2940_p9  ;;  %p2223_p3 = scmp.lt.u32.totalorder %s2214_s17, %s2626_s12 }
  0x7f   : > { %p2222_p11 = por %p2221_p6, %p2220_p13 }
  0x80   : > { %p2218_p10 = pneg %p2217_p2 }
  0x81   : > { %p2224_p8 = por %p2223_p3, %p2222_p11 }
  0x83   : > { %p2225_p5 = pnand %p2224_p8, %p2218_p10 }
  0x85   : > { %2228 = shalt.err (!%p2225_p5)
}
  0x86   : > { %s2229_s11 = scalar_lea.vmem %s244_s27, 128  ;;  %s2373_s23 = smov [#allocation2]  }
  0x87   : > { %p2230_p12 = scmp.ne.s32.totalorder %s244_s27, %s2229_s11  ;;  %s2234_s29 = sshll.u32 %s2373_s23, 4  ;;  %s2235_s29 = int_to_ptr.vmem [resolvable:$false] %s2234_s29 }
  0x88   : > { %s2236_s14 = scalar_lea.vmem %s2235_s29, 256  ;;  %p2237_p0 = scmp.lt.s32.totalorder %s244_s27, %s2235_s29 }
  0x89   : > { %p2232_p1 = pnand %p2230_p12, %p2940_p9  ;;  %p2238_p7 = scmp.lt.s32.totalorder %s2236_s14, %s2229_s11 }
  0x8b   : > { %p2233_p4 = pneg %p2232_p1  ;;  %p2239_p2 = por %p2238_p7, %p2237_p0 }
  0x8d   : > { %p2240_p6 = pnand %p2239_p2, %p2233_p4 }
  0x8f   : > { %2243 = shalt.err (!%p2240_p6)
}
  0x90   : > { %p2941_p13 = scmp.ne.s32.totalorder %s2929_s25, 0  ;;  %s2244_s16 = scalar_lea.hbm %s2597_s7, 512 }
  0x91   : > { %p2245_p10 = scmp.ne.s32.totalorder %s2597_s7, %s2244_s16  ;;  %s2249_s17 = scalar_lea.hbm %s2882_s2, 1024 }
  0x92   : > { %2017 = dma.hbm_to_vmem [thread:$0]  (!%p2941_p13), %s2626_s12, 128, %s244_s27, %s232_s9  }
  0x93   : > { %p2247_p11 = pnand %p2245_p10, %p2940_p9  ;;  %p2250_p8 = scmp.lt.u32.totalorder %s2597_s7, %s2882_s2 }
  0x94   : > { %p2251_p5 = scmp.lt.u32.totalorder %s2249_s17, %s2244_s16  ;;  %p2253_p1 = scmp.lt.u32.totalorder %s2244_s16, %s2597_s7 }
  0x95   : > { %p2248_p3 = pneg %p2247_p11 }
  0x96   : > { %p2252_p12 = por %p2251_p5, %p2250_p8 }
  0x98   : > { %p2254_p4 = por %p2253_p1, %p2252_p12 }
  0x9a   : > { %p2255_p0 = pnand %p2254_p4, %p2248_p3 }
  0x9c   : > { %2258 = shalt.err (!%p2255_p0)
}
  0x9d   : > { %s2259_s12 = scalar_lea.vmem %s2628_s1, 512  ;;  %s2374_s27 = smov [#allocation7]  }
  0x9e   : > { %p2260_p7 = scmp.ne.s32.totalorder %s2628_s1, %s2259_s12  ;;  %s2264_s9 = sshll.u32 %s2374_s27, 4  ;;  %s2265_s9 = int_to_ptr.vmem [resolvable:$false] %s2264_s9 }
  0x9f   : > { %s2266_s5 = scalar_lea.vmem %s2265_s9, 1024  ;;  %p2267_p10 = scmp.lt.s32.totalorder %s2628_s1, %s2265_s9 }
  0xa0   : > { %p2262_p2 = pnand %p2260_p7, %p2940_p9  ;;  %p2268_p11 = scmp.lt.s32.totalorder %s2266_s5, %s2259_s12 }
  0xa2   : > { %p2263_p6 = pneg %p2262_p2  ;;  %p2269_p8 = por %p2268_p11, %p2267_p10 }
  0xa4   : > { %p2270_p5 = pnand %p2269_p8, %p2263_p6 }
  0xa6   : > { %2273 = shalt.err (!%p2270_p5)
}
  0xa7   : > { %2023 = dma.hbm_to_vmem [thread:$0]  (!%p2941_p13), %s2597_s7, 512, %s2628_s1, %s2559_s13, %s2934_s26, %s2934_s26, %s2368_s15  }
  0xa8   : > { %p2942_p9 = scmp.ne.s32.totalorder %s2923_s6, 0 }
  0xa9   : > { %s2676_s18 = sand.u32 (!%p2942_p9), 1, %s2348_s19   ;;  %p2943_p3 = scmp.ne.s32.totalorder (!%p2942_p9), %s2918_s28, 0 }
  0xaa   : > { %294 = sbr.rel (%p2942_p9) target bundleno = 2591 (0xa1f), region = 40  ;;  %s1654_s20 = sshll.u32 (!%p2942_p9), %s2676_s18, 3 }
  0xab   : > { %s297_s21 = scalar_lea.sflag (!%p2942_p9), [#allocation3], %s2676_s18  ;;  %s2682_s25 = scalar_lea.vmem (!%p2942_p9), [#allocation2], %s1654_s20 }
  0xb1   : > { %2327 = dma.done.wait (%p2943_p3), %s297_s21, 128  }
  0xb2   : > { %2329 = vsyncadd (%p2943_p3), %s297_s21, 4294967168  ;;  %s305_s1 = sand.u32 1, %s2441_s24   ;;  %s1655_s6 = sshll.u32 %s2676_s18, 5 }
  0xb3   : > { %s306_s15 = scalar_lea.sflag [#allocation6], %s305_s1  ;;  %s2690_s13 = scalar_lea.vmem [#allocation5], %s1655_s6 }
  0xb4   : > { %2331 = dma.done.wait (%p2943_p3), %s306_s15, 1024  }
  0xb5   : > { %2333 = vsyncadd (%p2943_p3), %s306_s15, 4294966272  ;;  %s2696_s26 = scalar_lea.vmem [#allocation7], %s1655_s6  ;;  %p2944_p13 = scmp.eq.s32.totalorder %s2441_s24, 0 }
  0xb7   : > { %2335 = dma.done.wait (%p2944_p13), [#allocation9], 8192   ;;  %p2945_p12 = pmov %p2944_p13 }
  0xb8   : > { %v2375_v0 = vmov 0.0   ;;  %v2376_v1 = vmov 0.0|0.0   ;;  %v373_v2 = vld [vmem:[#allocation8 + $0x8] sm:$0xff]  ;;  %v375_v3 = vld [vmem:[#allocation8 + $0x18] sm:$0xff]  ;;  %v372_v4 = vld [vmem:[#allocation8] sm:$0xff]  ;;  %vm475_vm0 = vcmask 523264  }
  0xb9   : > { %2337 = vsyncadd (%p2945_p12), [#allocation9], 4294959104  ;;  %468 = vmatprep.mubr.f32.mxu0 %v2375_v0  ;;  %1910 = vmatprep.subr.bf16.mxu1 %v2376_v1  ;;  %v1878_v5 = vpack.c.bf16 %v375_v3, %v373_v2  ;;  %v374_v6 = vld [vmem:[#allocation8 + $0x10] sm:$0xff]  ;;  %v377_v7 = vld [vmem:[#allocation8 + $0x28] sm:$0xff]  ;;  %vm2377_vm2 = vmmov 0   ;;  %s2378_s24 = smov 64  }
  0xba   : > { %v379_v8 = vld [vmem:[#allocation8 + $0x38] sm:$0xff]  ;;  %v1880_v9 = vpack.c.bf16 %v374_v6, %v372_v4  ;;  %v376_v11 = vld [vmem:[#allocation8 + $0x20] sm:$0xff]  ;;  %v378_v12 = vld [vmem:[#allocation8 + $0x30] sm:$0xff]  ;;  %1750 = vmatprep.mubr.msk.f32.mxu1 %vm2377_vm2, %v2375_v0  ;;  %vm555_vm3 = vcmask 130048   ;;  %s2948_s28 = sld [smem:[#allocation18_spill]]  ;;  %s2949_s7 = sld [smem:[#allocation20_spill]] }
  0xbb   : > { %v1882_v10 = vpack.c.bf16 %v379_v8, %v377_v7  ;;  %v381_v13 = vld [vmem:[#allocation8 + $0x48] sm:$0xff]  ;;  %1879 = vmatprep.subr.bf16.mxu0 %v1878_v5  ;;  %v383_v14 = vld [vmem:[#allocation8 + $0x58] sm:$0xff]  ;;  %v1884_v15 = vpack.c.bf16 %v378_v12, %v376_v11  ;;  %v380_v17 = vld [vmem:[#allocation8 + $0x40] sm:$0xff]  ;;  %s362_s23 = scalar_lea.vmem [#allocation11], %s1654_s20  ;;  %s2950_s8 = sld [smem:[#allocation26_spill]] }
  0xbc   : > { %1881 = vmatpush1.bf16.msra.mxu0 %v1880_v9  ;;  %v1886_v16 = vpack.c.bf16 %v383_v14, %v381_v13  ;;  %v382_v18 = vld [vmem:[#allocation8 + $0x50] sm:$0xff]  ;;  %v385_v19 = vld [vmem:[#allocation8 + $0x68] sm:$0xff]  ;;  %v387_v20 = vld [vmem:[#allocation8 + $0x78] sm:$0xff]  ;;  %s1497_s29 = sshll.u32 %s362_s23, 4  ;;  %s1483_s17 = scalar_lea.sflag [#allocation4], %s2676_s18  ;;  %s2833_s29 = int_to_ptr.vmem [resolvable:$true] %s1497_s29 }
  0xbd   : > { %1883 = vmatprep.subr.bf16.mxu0 %v1882_v10  ;;  %v1888_v21 = vpack.c.bf16 %v382_v18, %v380_v17  ;;  %v1890_v22 = vpack.c.bf16 %v387_v20, %v385_v19  ;;  %v384_v23 = vld [vmem:[#allocation8 + $0x60] sm:$0xff]  ;;  %v386_v24 = vld [vmem:[#allocation8 + $0x70] sm:$0xff]  ;;  %v389_v25 = vld [vmem:[#allocation8 + $0x88] sm:$0xff]  ;;  %s2274_s10 = scalar_lea.vmem %s2833_s29, 128  ;;  %s2379_s3 = smov [#allocation11]  }
  0xbe   : > { %v391_v26 = vld [vmem:[#allocation8 + $0x98] sm:$0xff]  ;;  %v2705_v27 = vld [vmem:[%s2690_s13] sm:$0xff]  ;;  %v366_v28 = vld [vmem:[%s2690_s13 + $0x10] sm:$0xff]  ;;  %v1892_v30 = vpack.c.bf16 %v386_v24, %v384_v23  ;;  %p2275_p1 = scmp.ne.s32.totalorder %s2833_s29, %s2274_s10  ;;  %s2278_s12 = sshll.u32 %s2379_s3, 4  ;;  %s2279_s12 = int_to_ptr.vmem [resolvable:$false] %s2278_s12 }
  0xbf   : > { %vm2710_vm1 = vmpackc.low %vm475_vm0, %vm475_vm0  ;;  %v1911_v31 = vpack.c.bf16 %v366_v28, %v2705_v27  ;;  %v1894_v32 = vpack.c.bf16 %v391_v26, %v389_v25  ;;  %v388_v33 = vld [vmem:[#allocation8 + $0x80] sm:$0xff]  ;;  %v390_v34 = vld [vmem:[#allocation8 + $0x90] sm:$0xff]  ;;  %v2092_v62 = vpack.i.bf16 %v366_v28, %v2705_v27  ;;  %s2280_s27 = scalar_lea.vmem %s2279_s12, 256  ;;  %p2281_p2 = scmp.lt.s32.totalorder %s2833_s29, %s2279_s12 }
  0xc0   : > { %1885 = vmatpush1.bf16.msra.mxu0 %v1884_v15  ;;  %v393_v35 = vld [vmem:[#allocation8 + $0xa8] sm:$0xff]  ;;  %v395_v36 = vld [vmem:[#allocation8 + $0xb8] sm:$0xff]  ;;  %v1896_v37 = vpack.c.bf16 %v390_v34, %v388_v33  ;;  %v392_v39 = vld [vmem:[#allocation8 + $0xa0] sm:$0xff]  ;;  %s1681_s11 = sshll.u32 %s2948_s28, 7  ;;  %p2951_p4 = scmp.ne.s32.totalorder %s2949_s7, 0 }
  0xc1   : > { %1887 = vmatprep.subr.bf16.mxu0 %v1886_v16  ;;  %1913 = vmatpush3.bf16.xpose.msk.msra.mxu1 %vm2710_vm1, %v1911_v31  ;;  %v1898_v38 = vpack.c.bf16 %v395_v36, %v393_v35  ;;  %v394_v40 = vld [vmem:[#allocation8 + $0xb0] sm:$0xff]  ;;  %v397_v41 = vld [vmem:[#allocation8 + $0xc8] sm:$0xff]  ;;  %v399_v42 = vld [vmem:[#allocation8 + $0xd8] sm:$0xff]  ;;  %s2831_s30 = scalar_lea.hbm %s2950_s8, %s1681_s11  ;;  %p2282_p6 = scmp.lt.s32.totalorder %s2280_s27, %s2274_s10 }
  0xc2   : > { %1914 = vmatprep.subr.bf16.mxu1 %v2376_v1  ;;  %v1900_v43 = vpack.c.bf16 %v394_v40, %v392_v39  ;;  %v1902_v44 = vpack.c.bf16 %v399_v42, %v397_v41  ;;  %v396_v45 = vld [vmem:[#allocation8 + $0xc0] sm:$0xff]  ;;  %v398_v46 = vld [vmem:[#allocation8 + $0xd0] sm:$0xff]  ;;  %v401_v47 = vld [vmem:[#allocation8 + $0xe8] sm:$0xff]  ;;  %p2276_p0 = pnand %p2275_p1, %p2951_p4 }
  0xc3   : > { %v403_v48 = vld [vmem:[#allocation8 + $0xf8] sm:$0xff]  ;;  %v1904_v49 = vpack.c.bf16 %v398_v46, %v396_v45  ;;  %v400_v51 = vld [vmem:[#allocation8 + $0xe0] sm:$0xff]  ;;  %v402_v52 = vld [vmem:[#allocation8 + $0xf0] sm:$0xff]  ;;  %p2283_p10 = por %p2282_p6, %p2281_p2 }
  0xc4   : > { %1889 = vmatpush1.bf16.msra.mxu0 %v1888_v21  ;;  %v1906_v50 = vpack.c.bf16 %v403_v48, %v401_v47  ;;  %v1908_v53 = vpack.c.bf16 %v402_v52, %v400_v51  ;;  %v363_v54 = vld [vmem:[%s2682_s25] sm:$0xff]  ;;  %v368_v60 = vld [vmem:[%s2696_s26] sm:$0xff]  ;;  %v2751_v21 = vld [vmem:[%s2696_s26 + $0x8] sm:$0xff]  ;;  %p2277_p7 = pneg %p2276_p0 }
  0xc5   : > { %1891 = vmatprep.subr.bf16.mxu0 %v1890_v22  ;;  %v370_v61 = vld [vmem:[%s2696_s26 + $0x10] sm:$0xff]  ;;  %v2754_v22 = vld [vmem:[%s2696_s26 + $0x18] sm:$0xff]  ;;  %v825_v31 = vld [vmem:[#allocation10 + $0x48] sm:$0xff] }
  0xc6   : > { %v1915_v63 = vpack.c.bf16 %v370_v61, %v368_v60  ;;  %v2097_v11 = vpack.i.bf16 %v370_v61, %v368_v60  ;;  %v1953_v23 = vpack.c.bf16 %v2754_v22, %v2751_v21  ;;  %v2107_v33 = vpack.i.bf16 %v2754_v22, %v2751_v21  ;;  %v826_v34 = vld [vmem:[#allocation10 + $0x50] sm:$0xff]  ;;  %v827_v35 = vld [vmem:[#allocation10 + $0x58] sm:$0xff]  ;;  %v641_v36 = vld [vmem:[#allocation10] sm:$0xff]  ;;  %p2284_p11 = pnand %p2283_p10, %p2277_p7 }
  0xc7   : > { %v828_v41 = vld [vmem:[#allocation10 + $0x60] sm:$0xff]  ;;  %v829_v42 = vld [vmem:[#allocation10 + $0x68] sm:$0xff]  ;;  %v644_v45 = vld [vmem:[#allocation10 + $0x18] sm:$0xff] }
  0xc8   : > { %1893 = vmatpush1.bf16.msra.mxu0 %v1892_v30  ;;  %v824_v30 = vld [vmem:[#allocation10 + $0x40] sm:$0xff]  ;;  %v830_v47 = vld [vmem:[#allocation10 + $0x70] sm:$0xff]  ;;  %v831_v48 = vld [vmem:[#allocation10 + $0x78] sm:$0xff] }
  0xc9   : > { %1895 = vmatprep.subr.bf16.mxu0 %v1894_v32  ;;  %v1925_v32 = vpack.c.bf16 %v825_v31, %v824_v30  ;;  %v646_v51 = vld [vmem:[#allocation10 + $0x28] sm:$0xff]  ;;  %v1142_v30 = vld [vmem:[#allocation10 + $0x80] sm:$0xff] }
  0xca   : > { %v365_v61 = vld [vmem:[%s2690_s13 + $0x8] sm:$0xff] }
  0xcb   : > { %v1143_v31 = vld [vmem:[#allocation10 + $0x88] sm:$0xff] }
  0xcc   : > { %1897 = vmatpush1.bf16.msra.mxu0 %v1896_v37  ;;  %v1928_v37 = vpack.c.bf16 %v827_v35, %v826_v34  ;;  %v1145_v34 = vld [vmem:[#allocation10 + $0x98] sm:$0xff] }
  0xcd   : > { %1899 = vmatprep.subr.bf16.mxu0 %v1898_v38  ;;  %v642_v38 = vld [vmem:[#allocation10 + $0x8] sm:$0xff] }
  0xce   : > { %v1937_v39 = vpack.c.bf16 %v642_v38, %v641_v36  ;;  %v1146_v36 = vld [vmem:[#allocation10 + $0xa0] sm:$0xff] }
  0xd0   : > { %1901 = vmatpush1.bf16.msra.mxu0 %v1900_v43  ;;  %v1931_v43 = vpack.c.bf16 %v829_v42, %v828_v41 }
  0xd1   : > { %1903 = vmatprep.subr.bf16.mxu0 %v1902_v44  ;;  %v643_v44 = vld [vmem:[#allocation10 + $0x10] sm:$0xff] }
  0xd2   : > { %v1940_v46 = vpack.c.bf16 %v644_v45, %v643_v44 }
  0xd4   : > { %1905 = vmatpush1.bf16.msra.mxu0 %v1904_v49  ;;  %v1934_v49 = vpack.c.bf16 %v831_v48, %v830_v47 }
  0xd5   : > { %1907 = vmatprep.subr.bf16.mxu0 %v1906_v50  ;;  %v645_v50 = vld [vmem:[#allocation10 + $0x20] sm:$0xff] }
  0xd6   : > { %v1943_v52 = vpack.c.bf16 %v646_v51, %v645_v50  ;;  %v1399_v50 = vld [vmem:[#allocation10 + $0xc0] sm:$0xff]  ;;  %v1400_v51 = vld [vmem:[#allocation10 + $0xc8] sm:$0xff] }
  0xd8   : > { %1909 = vmatpush1.bf16.msra.mxu0 %v1908_v53  ;;  %v647_v53 = vld [vmem:[#allocation10 + $0x30] sm:$0xff] }
  0xd9   : > { %1924 = vmatprep.subr.bf16.mxu0 %v2376_v1 }
  0xdb   : > { %469 = vmatmul.mubr.f32.vlgmr.msra.gmra.mrb[0].mxu0 %v363_v54  ;;  %v648_v54 = vld [vmem:[#allocation10 + $0x38] sm:$0xff] }
  0xdc   : > { %1790 = vmatprep.mubr.msk.f32.mxu0 %vm2377_vm2, %v2375_v0  ;;  %1926 = vmatpush3.bf16.msra.mxu0 %v1925_v32  ;;  %v1956_v32 = vpack.c.bf16 %v1143_v31, %v1142_v30 }
  0xdd   : > { %1927 = vmatprep.subr.bf16.mxu0 %v2376_v1 }
  0xe0   : > { %1929 = vmatpush3.bf16.msra.mxu0 %v1928_v37  ;;  %v1147_v37 = vld [vmem:[#allocation10 + $0xa8] sm:$0xff] }
  0xe1   : > { %1930 = vmatprep.subr.bf16.mxu0 %v2376_v1  ;;  %v1962_v38 = vpack.c.bf16 %v1147_v37, %v1146_v36 }
  0xe4   : > { %1932 = vmatpush3.bf16.msra.mxu0 %v1931_v43 }
  0xe5   : > { %1933 = vmatprep.subr.bf16.mxu0 %v2376_v1 }
  0xe8   : > { %1935 = vmatpush3.bf16.msra.mxu0 %v1934_v49 }
  0xe9   : > { %1948 = vmatprep.subr.bf16.mxu0 %v2376_v1 }
 0x1ae   : > { %v470_v55 = vpop.f32.mrb[0].mxu0 }
 0x1af   : > { %649 = vrot.lane.b32.xlu1 %v470_v55, %s2378_s24  ;;  %v2725_v56 = vpop.f32.mrb[1].mxu0  ;;  %1751 = vmatmul.mubr.msk.f32.vlgmr.msra.gmra.mrb[0].mxu1 %vm475_vm0, %v470_v55  ;;  %v1946_v55 = vpack.c.bf16 %v648_v54, %v647_v53  ;;  %v1975_v53 = vpack.c.bf16 %v1400_v51, %v1399_v50  ;;  %v1402_v54 = vld [vmem:[#allocation10 + $0xd8] sm:$0xff] }
 0x1b0   : > { %1757 = vmatprep.mubr.msk.f32.mxu1 %vm2377_vm2, %v2375_v0  ;;  %1916 = vmatpush3.bf16.msra.mxu1 %v1915_v63 }
 0x1b1   : > { %1917 = vmatprep.subr.bf16.mxu1 %v2376_v1 }
 0x221   : > { %v650_v10 = vpop.permute.xlu1 %649 }
 0x282   : > { %v551_v57 = vpop.f32.mrb[0].mxu1 }
 0x283   : > { %v1752_v58 = vpop.f32.mrb[1].mxu1  ;;  %v556_v59 = vsel %vm555_vm3, %v551_v57, -inf }
 0x284   : > { %557 = vmax.xlane.f32.xlu0 %v556_v59 }
 0x29a   : > { %2093 = vrot.lane.b32.xlu0 %v2092_v62, %s2378_s24  ;;  %v367_v62 = vld [vmem:[%s2690_s13 + $0x18] sm:$0xff] }
 0x29e   : > { %2098 = vrot.lane.b32.xlu0 %v2097_v11, %s2378_s24 }
 0x311   : > { %v558_v2 = vpop.xlane.xlu0 %557 }
 0x312   : > { %v559_v3 = vsub.f32 %v551_v57, %v558_v2 }
 0x314   : > { %v560_v4 = vmul.f32 1.442695, %v559_v3 }
 0x315   : > { %v2094_v5 = vpop.permute.xlu0 %2093 }
 0x316   : > { %2112 = vpow2.f32 %v560_v4  ;;  %v2096_v6 = vunpack.i.h.bf16 %v2094_v5  ;;  %v2095_v7 = vunpack.i.l.bf16 %v2094_v5  ;;  %v1949_v5 = vpack.c.bf16 %v367_v62, %v365_v61 }
 0x318   : > { %v1918_v8 = vpack.c.bf16 %v2096_v6, %v2095_v7 }
 0x319   : > { %v2099_v17 = vpop.permute.xlu0 %2098 }
 0x31a   : > { %v2101_v18 = vunpack.i.h.bf16 %v2099_v17  ;;  %v2100_v19 = vunpack.i.l.bf16 %v2099_v17 }
 0x31c   : > { %v1922_v20 = vpack.c.bf16 %v2101_v18, %v2100_v19 }
 0x320   : > { %v2113_v9 = vpop.eup %2112 }
 0x321   : > { %1758 = vmatmul.mubr.msk.f32.vlgmr.msra.gmra.mrb[2].mxu1 %vm555_vm3, %v2113_v9  ;;  %v562_v40 = vsel %vm555_vm3, %v2113_v9, 0.0 }
 0x322   : > { %1920 = vmatpush3.bf16.xpose.msk.msra.mxu1 %vm2710_vm1, %v1918_v8  ;;  %1764 = vmatprep.mubr.msk.f32.mxu1 %vm2377_vm2, %v2375_v0 }
 0x323   : > { %1921 = vmatprep.subr.bf16.mxu1 %v2376_v1 }
 0x329   : > { %1765 = vmatmul.mubr.msk.f32.vlgmr.msra.gmra.mrb[4].mxu1 %vm475_vm0, %v650_v10 }
 0x32a   : > { %1771 = vmatprep.mubr.msk.f32.mxu1 %vm2377_vm2, %v2375_v0  ;;  %1923 = vmatpush3.bf16.msra.mxu1 %v1922_v20 }
 0x32b   : > { %1936 = vmatprep.subr.bf16.mxu1 %v2376_v1 }
 0x3f4   : > { %v2746_v12 = vpop.f32.mrb[2].mxu1 }
 0x3f5   : > { %v1759_v13 = vpop.f32.mrb[3].mxu1 }
 0x3f6   : > { %v2102_v13 = vpack.i.bf16 %v367_v62, %v365_v61 }
 0x3fc   : > { %v727_v14 = vpop.f32.mrb[4].mxu1 }
 0x3fd   : > { %v1766_v15 = vpop.f32.mrb[5].mxu1  ;;  %v731_v16 = vsel %vm555_vm3, %v727_v14, -inf }
 0x3fe   : > { %732 = vmax.xlane.f32.xlu1 %v731_v16 }
 0x48b   : > { %v733_v24 = vpop.xlane.xlu1 %732 }
 0x48c   : > { %v734_v25 = vsub.f32 %v727_v14, %v733_v24 }
 0x48e   : > { %v735_v26 = vmul.f32 1.442695, %v734_v25 }
 0x490   : > { %2114 = vpow2.f32 %v735_v26 }
 0x49a   : > { %v2115_v27 = vpop.eup %2114 }
 0x49b   : > { %1772 = vmatmul.mubr.msk.f32.vlgmr.msra.gmra.mrb[6].mxu1 %vm555_vm3, %v2115_v27  ;;  %v737_v28 = vsel %vm555_vm3, %v2115_v27, 0.0 }
 0x49c   : > { %738 = vadd.xlane.f32.xlu0 %v737_v28  ;;  %1809 = vmatprep.mubr.msk.f32.mxu1 %vm2377_vm2, %v2375_v0 }
 0x49d   : > { %1938 = vmatpush3.bf16.msra.mxu1 %v1937_v39  ;;  %v1148_v39 = vld [vmem:[#allocation10 + $0xb0] sm:$0xff] }
 0x49e   : > { %1939 = vmatprep.subr.bf16.mxu1 %v2376_v1 }
 0x4a1   : > { %1941 = vmatpush3.bf16.msra.mxu1 %v1940_v46 }
 0x4a2   : > { %1942 = vmatprep.subr.bf16.mxu1 %v2376_v1 }
 0x4a5   : > { %1944 = vmatpush3.bf16.msra.mxu1 %v1943_v52  ;;  %v1401_v52 = vld [vmem:[#allocation10 + $0xd0] sm:$0xff] }
 0x4a6   : > { %1945 = vmatprep.subr.bf16.mxu1 %v2376_v1 }
 0x4a9   : > { %1947 = vmatpush3.bf16.msra.mxu1 %v1946_v55  ;;  %v1978_v55 = vpack.c.bf16 %v1402_v54, %v1401_v52 }
 0x4aa   : > { %1955 = vmatprep.subr.bf16.mxu1 %v2376_v1 }
 0x4b2   : > { %1224 = vrot.lane.b32.xlu0 %v2725_v56, %s2378_s24 }
 0x4b6   : > { %2108 = vrot.lane.b32.xlu0 %v2107_v33, %s2378_s24  ;;  %v1144_v33 = vld [vmem:[#allocation10 + $0x90] sm:$0xff] }
 0x4b7   : > { %v1959_v35 = vpack.c.bf16 %v1145_v34, %v1144_v33 }
 0x4d5   : > { %563 = vadd.xlane.f32.xlu0 %v562_v40  ;;  %v1149_v40 = vld [vmem:[#allocation10 + $0xb8] sm:$0xff] }
 0x4d6   : > { %v1965_v41 = vpack.c.bf16 %v1149_v40, %v1148_v39 }
 0x529   : > { %v739_v57 = vpop.xlane.xlu0 %738 }
 0x52d   : > { %v1225_v58 = vpop.permute.xlu0 %1224 }
 0x531   : > { %v2109_v59 = vpop.permute.xlu0 %2108 }
 0x532   : > { %v2111_v21 = vunpack.i.h.bf16 %v2109_v59  ;;  %v2110_v22 = vunpack.i.l.bf16 %v2109_v59 }
 0x562   : > { %v564_v60 = vpop.xlane.xlu0 %563 }
 0x563   : > { %2116 = vrcp.f32 %v564_v60  ;;  %v1406_v60 = vld [vmem:[#allocation10 + $0xf8] sm:$0xff] }
 0x564   : > { %2118 = vrcp.f32 %v739_v57  ;;  %v1403_v57 = vld [vmem:[#allocation10 + $0xe0] sm:$0xff] }
 0x56d   : > { %v2117_v63 = vpop.eup %2116 }
 0x56e   : > { %v2119_v2 = vpop.eup %2118  ;;  %v640_v3 = vmul.f32 %v2117_v63, %v2746_v12  ;;  %v817_v4 = vpop.f32.mrb[6].mxu1 }
 0x56f   : > { %v823_v6 = vmul.f32 %v2119_v2, %v817_v4  ;;  %v1773_v7 = vpop.f32.mrb[7].mxu1 }
 0x570   : > { %1810 = vmatmul.mubr.msk.f32.vlgmr.msra.gmra.mrb[8].mxu1 %vm475_vm0, %v640_v3 }
 0x571   : > { %1791 = vmatmul.mubr.msk.f32.vlgmr.msra.gmra.mrb[2].mxu0 %vm475_vm0, %v823_v6  ;;  %1842 = vmatprep.mubr.msk.f32.mxu1 %vm2377_vm2, %v2375_v0 }
 0x572   : > { %1951 = vmatpush3.bf16.xpose.msk.msra.mxu0 %vm2710_vm1, %v1949_v5  ;;  %1816 = vmatprep.mubr.msk.f32.mxu0 %vm2377_vm2, %v2375_v0 }
 0x573   : > { %1952 = vmatprep.subr.bf16.mxu0 %v2376_v1  ;;  %1957 = vmatpush3.bf16.msra.mxu1 %v1956_v32 }
 0x574   : > { %1958 = vmatprep.subr.bf16.mxu1 %v2376_v1 }
 0x577   : > { %1960 = vmatpush3.bf16.msra.mxu1 %v1959_v35 }
 0x578   : > { %1961 = vmatprep.subr.bf16.mxu1 %v2376_v1 }
 0x579   : > { %1817 = vmatmul.mubr.msk.f32.vlgmr.msra.gmra.mrb[4].mxu0 %vm475_vm0, %v2725_v56 }
 0x57a   : > { %1954 = vmatpush3.bf16.msra.mxu0 %v1953_v23  ;;  %1823 = vmatprep.mubr.msk.f32.mxu0 %vm2377_vm2, %v2375_v0  ;;  %v1972_v23 = vpack.c.bf16 %v2111_v21, %v2110_v22 }
 0x57b   : > { %1967 = vmatprep.subr.bf16.mxu0 %v2376_v1  ;;  %1963 = vmatpush3.bf16.msra.mxu1 %v1962_v38 }
 0x57c   : > { %1964 = vmatprep.subr.bf16.mxu1 %v2376_v1 }
 0x57f   : > { %1966 = vmatpush3.bf16.msra.mxu1 %v1965_v41 }
 0x580   : > { %1974 = vmatprep.subr.bf16.mxu1 %v2376_v1 }
 0x644   : > { %v2796_v8 = vpop.f32.mrb[2].mxu0 }
 0x645   : > { %v1792_v9 = vpop.f32.mrb[3].mxu0 }
 0x64c   : > { %v1053_v10 = vpop.f32.mrb[4].mxu0 }
 0x64d   : > { %v1818_v11 = vpop.f32.mrb[5].mxu0  ;;  %v1057_v12 = vsel %vm555_vm3, %v1053_v10, -inf }
 0x64e   : > { %1058 = vmax.xlane.f32.xlu1 %v1057_v12 }
 0x65f   : > { %2103 = vrot.lane.b32.xlu1 %v2102_v13, %s2378_s24 }
 0x6db   : > { %v1059_v56 = vpop.xlane.xlu1 %1058 }
 0x6dc   : > { %v1060_v14 = vsub.f32 %v1053_v10, %v1059_v56 }
 0x6de   : > { %v1061_v15 = vmul.f32 1.442695, %v1060_v14 }
 0x6df   : > { %v2104_v16 = vpop.permute.xlu1 %2103 }
 0x6e0   : > { %2120 = vpow2.f32 %v1061_v15  ;;  %v2106_v17 = vunpack.i.h.bf16 %v2104_v16  ;;  %v2105_v18 = vunpack.i.l.bf16 %v2104_v16 }
 0x6e2   : > { %v1968_v19 = vpack.c.bf16 %v2106_v17, %v2105_v18 }
 0x6ea   : > { %v2121_v20 = vpop.eup %2120 }
 0x6eb   : > { %1824 = vmatmul.mubr.msk.f32.vlgmr.msra.gmra.mrb[6].mxu0 %vm555_vm3, %v2121_v20  ;;  %v1063_v29 = vsel %vm555_vm3, %v2121_v20, 0.0 }
 0x6ec   : > { %1970 = vmatpush3.bf16.xpose.msk.msra.mxu0 %vm2710_vm1, %v1968_v19  ;;  %1849 = vmatprep.mubr.msk.f32.mxu0 %vm2377_vm2, %v2375_v0 }
 0x6ed   : > { %1971 = vmatprep.subr.bf16.mxu0 %v2376_v1 }
 0x6f3   : > { %1850 = vmatmul.mubr.msk.f32.vlgmr.msra.gmra.mrb[8].mxu0 %vm475_vm0, %v1225_v58  ;;  %v1404_v58 = vld [vmem:[#allocation10 + $0xe8] sm:$0xff] }
 0x6f4   : > { %1973 = vmatpush3.bf16.msra.mxu0 %v1972_v23  ;;  %1856 = vmatprep.mubr.msk.f32.mxu0 %vm2377_vm2, %v2375_v0  ;;  %v1981_v59 = vpack.c.bf16 %v1404_v58, %v1403_v57 }
 0x7be   : > { %v1135_v24 = vpop.f32.mrb[6].mxu0 }
 0x7bf   : > { %v1825_v25 = vpop.f32.mrb[7].mxu0 }
 0x7c6   : > { %v1302_v26 = vpop.f32.mrb[8].mxu0 }
 0x7c7   : > { %v1851_v27 = vpop.f32.mrb[9].mxu0  ;;  %v1306_v28 = vsel %vm555_vm3, %v1302_v26, -inf }
 0x7c8   : > { %1307 = vmax.xlane.f32.xlu1 %v1306_v28 }
 0x7cc   : > { %1064 = vadd.xlane.f32.xlu1 %v1063_v29 }
 0x855   : > { %v1308_v42 = vpop.xlane.xlu1 %1307 }
 0x856   : > { %v1309_v43 = vsub.f32 %v1302_v26, %v1308_v42 }
 0x858   : > { %v1310_v44 = vmul.f32 1.442695, %v1309_v43 }
 0x859   : > { %v1065_v45 = vpop.xlane.xlu1 %1064 }
 0x85a   : > { %2122 = vpow2.f32 %v1310_v44 }
 0x85b   : > { %2124 = vrcp.f32 %v1065_v45 }
 0x864   : > { %v2123_v46 = vpop.eup %2122 }
 0x865   : > { %v2125_v47 = vpop.eup %2124  ;;  %1857 = vmatmul.mubr.msk.f32.vlgmr.msra.gmra.mrb[10].mxu0 %vm555_vm3, %v2123_v46  ;;  %v1312_v48 = vsel %vm555_vm3, %v2123_v46, 0.0 }
 0x866   : > { %v1141_v49 = vmul.f32 %v2125_v47, %v1135_v24  ;;  %1313 = vadd.xlane.f32.xlu1 %v1312_v48 }
 0x868   : > { %1843 = vmatmul.mubr.msk.f32.vlgmr.msra.gmra.mrb[8].mxu1 %vm475_vm0, %v1141_v49 }
 0x869   : > { %1875 = vmatprep.mubr.msk.f32.mxu1 %vm2377_vm2, %v2375_v0  ;;  %1976 = vmatpush3.bf16.msra.mxu1 %v1975_v53  ;;  %v1405_v0 = vld [vmem:[#allocation10 + $0xf0] sm:$0xff] }
 0x86a   : > { %1977 = vmatprep.subr.bf16.mxu1 %v2376_v1  ;;  %v1984_v61 = vpack.c.bf16 %v1406_v60, %v1405_v0 }
 0x86d   : > { %1979 = vmatpush3.bf16.msra.mxu1 %v1978_v55 }
 0x86e   : > { %1980 = vmatprep.subr.bf16.mxu1 %v2376_v1 }
 0x871   : > { %1982 = vmatpush3.bf16.msra.mxu1 %v1981_v59 }
 0x872   : > { %1983 = vmatprep.subr.bf16.mxu1 %v2376_v1 }
 0x875   : > { %1985 = vmatpush3.bf16.msra.mxu1 %v1984_v61 }
 0x8f3   : > { %v1314_v62 = vpop.xlane.xlu1 %1313 }
 0x8f4   : > { %2126 = vrcp.f32 %v1314_v62 }
 0x8fe   : > { %v2127_v63 = vpop.eup %2126 }
 0x938   : > { %v1392_v2 = vpop.f32.mrb[10].mxu0 }
 0x939   : > { %v1398_v3 = vmul.f32 %v2127_v63, %v1392_v2  ;;  %v1858_v4 = vpop.f32.mrb[11].mxu0 }
 0x93b   : > { %1876 = vmatmul.mubr.msk.f32.vlgmr.msra.gmra.mrb[8].mxu1 %vm475_vm0, %v1398_v3 }
 0xa0e   : > { %v1476_v5 = vpop.f32.mrb[8].mxu1 }
 0xa0f   : > { %v1986_v1 = vadd.f32 %v1476_v5, %v2796_v8  ;;  %v1877_v6 = vpop.f32.mrb[9].mxu1 }
 0xa11   : > { %1481 = vst [vmem:[%s362_s23] sm:$0xff] %v1986_v1 }
 0xa12   : > { %2287 = shalt.err (!%p2284_p11)
}
 0xa13   : > { %s2288_s9 = scalar_lea.hbm %s2831_s30, 128  ;;  %s2292_s20 = scalar_lea.hbm %s2950_s8, 256 }
 0xa14   : > { %p2289_p8 = scmp.ne.s32.totalorder %s2831_s30, %s2288_s9  ;;  %p2293_p3 = scmp.lt.u32.totalorder %s2831_s30, %s2950_s8 }
 0xa15   : > { %p2294_p13 = scmp.lt.u32.totalorder %s2292_s20, %s2288_s9  ;;  %p2296_p1 = scmp.lt.u32.totalorder %s2288_s9, %s2831_s30 }
 0xa16   : > { %p2290_p5 = pnand %p2289_p8, %p2951_p4 }
 0xa17   : > { %p2295_p12 = por %p2294_p13, %p2293_p3 }
 0xa18   : > { %p2291_p9 = pneg %p2290_p5 }
 0xa19   : > { %p2297_p0 = por %p2296_p1, %p2295_p12 }
 0xa1b   : > { %p2298_p7 = pnand %p2297_p0, %p2291_p9 }
 0xa1d   : > { %2301 = shalt.err (!%p2298_p7)
}
 0xa1e   : > { %2005 = dma.vmem_to_hbm [thread:$0]  (%p2951_p4), %s2833_s29, 128, %s2831_s30, %s1483_s17  }
 0xa1f PF: > { %s2952_s1 = sld [smem:[#allocation16_spill]]  ;;  %s2953_s6 = sld [smem:[#allocation21_spill]] }
 0xa20   : > { %s2954_s15 = sld [smem:[#allocation19_spill]] }
 0xa25   : > { %s1509_s13 = sand.u32 1, %s2952_s1   ;;  %p2955_p2 = scmp.ne.s32.totalorder %s2953_s6, 0 }
 0xa26   : > { %p2956_p6 = scmp.ge.s32.totalorder %s2954_s15, 2  ;;  %s1510_s26 = scalar_lea.sflag [#allocation4], %s1509_s13 }
 0xa28   : > { %p2025_p10 = pnand %p2956_p6, %p2955_p2 }
 0xa2a   : > { %2339 = dma.done.wait (!%p2025_p10), %s1510_s26, 128  }
 0xa2b   : > { %2341 = vsyncadd (!%p2025_p10), %s1510_s26, 4294967168  ;;  %s25_s23 = sadd.s32 1, %s2954_s15   ;;  %s2957_s24 = sld [smem:[#allocation17_spill]] }
 0xa2c   : > { %p22_p11 = scmp.ge.s32.totalorder %s25_s23, 4   ;;  %s2958_s20 = sld [smem:[#allocation23_spill]] }
 0xa2d   : > { %s2959_s28 = sld [smem:[#allocation22_spill]]  ;;  %s2960_s18 = smov %s2348_s19 }
 0xa2e   : > { %s2962_s21 = smov %s2360_s22  ;;  %24 = sbr.rel (!%p22_p11) target bundleno = 13 (0xd), region = 117 }
 0xa31   : > { %s2961_s19 = smov %s2957_s24 }
 0xa33   : > { %s2963_s22 = smov %s2959_s28 }
 0xa35   :  { %1515 = vsyncpa [#allocation3], 1 }
 0xa36   :  { %1517 = vsyncpa [#allocation3 + $0x1], 1 }
 0xa37   :  { %1518 = vsyncpa [#allocation6], 1 }
 0xa38   :  { %1520 = vsyncpa [#allocation6 + $0x1], 1 }
 0xa39   :  { %1521 = vsyncpa [#allocation9], 1 }
 0xa3a   :  { %1522 = vsyncpa [#allocation4], 1 }
 0xa3b   :  { %1524 = vsyncpa [#allocation4 + $0x1], 1 }

</bundles_post_ra>
